<compile_context>
chip_gen: v7x
topology: tpu7x:2x2x1
jax: 0.10.0
libtpu: 0.0.40
codegen_flags: <defaults>
</compile_context>

<pallas_src>
import jax
import jax.numpy as jnp
from jax.experimental import pallas as pl
from jax.experimental.pallas import tpu as pltpu

# ---- hyperparameters fixed by the PyTorch module ---------------------------
BETA = 1.0
THRESHOLD = 0.1
NUM_INPUTS = 28 * 28      # 784
NUM_HIDDEN = 1000
NUM_OUTPUTS = 10
NUM_STEPS = 25


def _round_up(x, m):
    return (x + m - 1) // m * m


def quantize_int8(w):
    # TODO(synk): exact Brevitas QuantLinear quantizer config is not in the
    # snippet; symmetric per-tensor int8 fake weight quantization is used as
    # the quant-aware-training proxy. W_q = w_int * scale is applied as an
    # integer-valued matmul followed by a per-tensor post-scale (exact).
    scale = jnp.max(jnp.abs(w)) / 127.0
    w_int = jnp.clip(jnp.round(w / scale), -127.0, 127.0)
    return w_int, scale


# ------------------- kernel #1: batched fc1 over all timesteps ---------------
def _fc1_kernel(spk_ref, w1_ref, scale1_ref, b1_ref, cur1_ref):
    # (T*B_P, IN_P) bf16 @ (IN_P, N_BLK) bf16 -> f32 (exact: 0/1 spikes and
    # int8 levels are exactly representable in bf16; integer partial sums fit
    # in f32), then per-tensor scale + bias.
    acc = jnp.dot(spk_ref[...], w1_ref[...], preferred_element_type=jnp.float32)
    cur1_ref[...] = acc * scale1_ref[...] + b1_ref[...]


# ------------- kernel #2: LIF1 -> fc2 -> LIF2 recurrence (single call) -------
def _lif_recurrent_kernel(cur1_ref, w2_ref, scale2_ref, b2_ref,
                          spk_out_ref, mem_out_ref):
    # Loop-invariant operands hoisted once (JAX does not CSE broadcasts).
    w2 = w2_ref[...]                # (HID_P, OUT_P) bf16, resident in VMEM
    scale2 = scale2_ref[...]        # (1, OUT_P) f32
    b2 = b2_ref[...]                # (1, OUT_P) f32

    n_steps, b_p, hid_p = cur1_ref.shape
    out_p = w2_ref.shape[1]

    # lif.init_leaky(): membranes start at zero; carried as loop values.
    mem1 = jnp.zeros((b_p, hid_p), jnp.float32)
    mem2 = jnp.zeros((b_p, out_p), jnp.float32)

    # T=25 recurrence fully unrolled at trace time (static indices -> static
    # VMEM loads/stores, full LLO scheduling visibility).
    for t in range(n_steps):
        cur1 = cur1_ref[t]                                        # (B_P, HID_P)

        # snn.Leaky #1: reset-by-subtract using previous mem, fire on new mem.
        reset1 = (mem1 > THRESHOLD).astype(jnp.float32)
        mem1 = BETA * mem1 + cur1 - reset1 * THRESHOLD
        spk1 = (mem1 > THRESHOLD).astype(jnp.bfloat16)            # exact 0/1

        # fc2 (QuantLinear): integer-level matmul + post-scale + bias.
        cur2 = jnp.dot(spk1, w2, preferred_element_type=jnp.float32) * scale2 + b2

        # snn.Leaky #2.
        reset2 = (mem2 > THRESHOLD).astype(jnp.float32)
        mem2 = BETA * mem2 + cur2 - reset2 * THRESHOLD
        spk2 = (mem2 > THRESHOLD).astype(jnp.float32)

        spk_out_ref[t] = spk2
        mem_out_ref[t] = mem2


# ------------------------------ wrapper --------------------------------------
def snn_forward_pallas(spikes, w1_int, scale1, b1, w2_int, scale2, b2):
    """spikes: [T, B, IN] float32 (0/1); w*_int: integer-valued fake-quant levels."""
    T, B, IN = spikes.shape
    HID = w1_int.shape[1]
    OUT = w2_int.shape[1]

    B_P = _round_up(max(B, 8), 8)
    IN_P = _round_up(IN, 128)
    HID_P = _round_up(HID, 128)
    OUT_P = _round_up(OUT, 128)
    TB = T * B_P

    # Pad + cast. 0/1 spikes and int8 weight levels are exact in bf16.
    spikes_p = (jnp.zeros((T, B_P, IN_P), jnp.bfloat16)
                .at[:, :B, :IN].set(spikes.astype(jnp.bfloat16)))
    spikes_2d = spikes_p.reshape(TB, IN_P)
    w1_p = (jnp.zeros((IN_P, HID_P), jnp.bfloat16)
            .at[:IN, :HID].set(w1_int.astype(jnp.bfloat16)))
    w2_p = (jnp.zeros((HID_P, OUT_P), jnp.bfloat16)
            .at[:HID, :OUT].set(w2_int.astype(jnp.bfloat16)))
    b1_p = jnp.zeros((1, HID_P), jnp.float32).at[0, :HID].set(b1)
    b2_p = jnp.zeros((1, OUT_P), jnp.float32).at[0, :OUT].set(b2)
    scale1_row = jnp.full((1, HID_P), scale1, jnp.float32)
    scale2_row = jnp.full((1, OUT_P), scale2, jnp.float32)

    # ---- kernel #1: cur1[t*B+b, h] for all timesteps in one big matmul -----
    N_BLK = 256 if HID_P % 256 == 0 else 128
    fc1_grid = (HID_P // N_BLK,)
    cur1_2d = pl.pallas_call(
        _fc1_kernel,
        grid_spec=pltpu.PrefetchScalarGridSpec(
            num_scalar_prefetch=0,
            grid=fc1_grid,
            in_specs=[
                pl.BlockSpec((TB, IN_P), lambda j: (0, 0)),     # spikes (resident)
                pl.BlockSpec((IN_P, N_BLK), lambda j: (0, j)),  # W1 int levels
                pl.BlockSpec((1, N_BLK), lambda j: (0, j)),     # scale1 row
                pl.BlockSpec((1, N_BLK), lambda j: (0, j)),     # b1
            ],
            out_specs=pl.BlockSpec((TB, N_BLK), lambda j: (0, j)),
        ),
        out_shape=jax.ShapeDtypeStruct((TB, HID_P), jnp.float32),
        compiler_params=pltpu.CompilerParams(
            dimension_semantics=("parallel",)),   # megacore-shardable on v7x
    )(spikes_2d, w1_p, scale1_row, b1_p)
    cur1_all = cur1_2d.reshape(T, B_P, HID_P)

    # ---- kernel #2: single-invocation LIF recurrence + fc2 -----------------
    spk2_p, mem2_p = pl.pallas_call(
        _lif_recurrent_kernel,
        grid_spec=pltpu.PrefetchScalarGridSpec(
            num_scalar_prefetch=0,
            grid=(1,),
            in_specs=[
                pl.BlockSpec((T, B_P, HID_P), lambda i: (0, 0, 0)),  # cur1
                pl.BlockSpec((HID_P, OUT_P), lambda i: (0, 0)),      # W2 int levels
                pl.BlockSpec((1, OUT_P), lambda i: (0, 0)),          # scale2 row
                pl.BlockSpec((1, OUT_P), lambda i: (0, 0)),          # b2
            ],
            out_specs=[
                pl.BlockSpec((T, B_P, OUT_P), lambda i: (0, 0, 0)),  # spk2_rec
                pl.BlockSpec((T, B_P, OUT_P), lambda i: (0, 0, 0)),  # mem2_rec
            ],
        ),
        out_shape=[
            jax.ShapeDtypeStruct((T, B_P, OUT_P), jnp.float32),
            jax.ShapeDtypeStruct((T, B_P, OUT_P), jnp.float32),
        ],
        compiler_params=pltpu.CompilerParams(
            dimension_semantics=("arbitrary",)),  # time recurrence, one TC
    )(cur1_all, w2_p, scale2_row, b2_p)

    return spk2_p[:, :B, :OUT], mem2_p[:, :B, :OUT]


# ----------------------- pure-JAX reference (for checking) -------------------
def snn_forward_ref(spikes, w1_int, scale1, b1, w2_int, scale2, b2):
    B = spikes.shape[1]
    HID = w1_int.shape[1]
    OUT = w2_int.shape[1]

    def step(carry, q):
        m1, m2 = carry
        cur1 = (q @ w1_int) * scale1 + b1
        r1 = (m1 > THRESHOLD).astype(jnp.float32)
        m1 = BETA * m1 + cur1 - r1 * THRESHOLD
        s1 = (m1 > THRESHOLD).astype(jnp.float32)
        cur2 = (s1 @ w2_int) * scale2 + b2
        r2 = (m2 > THRESHOLD).astype(jnp.float32)
        m2 = BETA * m2 + cur2 - r2 * THRESHOLD
        s2 = (m2 > THRESHOLD).astype(jnp.float32)
        return (m1, m2), (s2, m2)

    init = (jnp.zeros((B, HID), jnp.float32),
            jnp.zeros((B, OUT), jnp.float32))
    _, (spk2, mem2) = jax.lax.scan(step, init, spikes)
    return spk2, mem2


# --------------------------------- main --------------------------------------
if __name__ == "__main__":
    key = jax.random.PRNGKey(0)
    k_x, k_spk, k_w1, k_b1, k_w2, k_b2 = jax.random.split(key, 6)

    batch = 2
    # x plays the role of a flattened MNIST image with values in [0, 1]
    x = jax.random.uniform(k_x, (batch, NUM_INPUTS), dtype=jnp.float32)

    # spikegen.rate(x, num_steps): Bernoulli spike train with rate = clamp(x,0,1)
    # (stochastic sampling done in host JAX with a fixed key, deterministic here).
    rates = jnp.clip(x, 0.0, 1.0)
    spikes = jax.random.bernoulli(
        k_spk, rates, (NUM_STEPS, batch, NUM_INPUTS)).astype(jnp.float32)

    # PyTorch nn.Linear-style deterministic init: U(-1/sqrt(fan_in), 1/sqrt(fan_in))
    bound1 = float(1.0 / jnp.sqrt(NUM_INPUTS))
    w1 = jax.random.uniform(k_w1, (NUM_INPUTS, NUM_HIDDEN),
                            minval=-bound1, maxval=bound1, dtype=jnp.float32)
    b1 = jax.random.uniform(k_b1, (NUM_HIDDEN,),
                            minval=-bound1, maxval=bound1, dtype=jnp.float32)
    bound2 = float(1.0 / jnp.sqrt(NUM_HIDDEN))
    w2 = jax.random.uniform(k_w2, (NUM_HIDDEN, NUM_OUTPUTS),
                            minval=-bound2, maxval=bound2, dtype=jnp.float32)
    b2 = jax.random.uniform(k_b2, (NUM_OUTPUTS,),
                            minval=-bound2, maxval=bound2, dtype=jnp.float32)

    # QuantLinear: symmetric per-tensor int8 fake-quant weights, fp bias/acts.
    w1_int, scale1 = quantize_int8(w1)
    w2_int, scale2 = quantize_int8(w2)

    spk2, mem2 = snn_forward_pallas(spikes, w1_int, scale1, b1,
                                    w2_int, scale2, b2)
    spk2 = jax.block_until_ready(spk2)
    mem2 = jax.block_until_ready(mem2)

    assert spk2.shape == (NUM_STEPS, batch, NUM_OUTPUTS)
    assert mem2.shape == (NUM_STEPS, batch, NUM_OUTPUTS)

    spk2_ref, mem2_ref = snn_forward_ref(spikes, w1_int, scale1, b1,
                                         w2_int, scale2, b2)
    assert float(jnp.max(jnp.abs(mem2 - mem2_ref))) < 1e-3
    assert float(jnp.mean(jnp.abs(spk2 - spk2_ref))) < 1e-3

    print("KERNEL_OK")
</pallas_src>

<mosaic_0001>
module attributes {stable_mosaic.version = 11 : i64} {
  func.func @_fc1_kernel(%arg0: i32, %arg1: memref<200x896xbf16, #tpu.memory_space<vmem>>, %arg2: memref<896x256xbf16, #tpu.memory_space<vmem>>, %arg3: memref<1x256xf32, #tpu.memory_space<vmem>>, %arg4: memref<1x256xf32, #tpu.memory_space<vmem>>, %arg5: memref<200x256xf32, #tpu.memory_space<vmem>>) attributes {dimension_semantics = [#tpu.dimension_semantics<parallel>], iteration_bounds = array<i64: 4>, scalar_prefetch = 0 : i64, scratch_operands = 0 : i64, tpu.core_type = #tpu.core_type<tc>, window_params = [{pipeline_mode = #tpu.pipeline_mode<synchronous>, transform_indices = @transform_0, window_bounds = array<i64: 200, 896>}, {transform_indices = @transform_1, window_bounds = array<i64: 896, 256>}, {transform_indices = @transform_2, window_bounds = array<i64: 1, 256>}, {transform_indices = @transform_3, window_bounds = array<i64: 1, 256>}, {transform_indices = @transform_4, window_bounds = array<i64: 200, 256>}]} {
    %c0 = arith.constant 0 : index
    %c0_0 = arith.constant 0 : index
    %0 = vector.load %arg1[%c0, %c0_0] : memref<200x896xbf16, #tpu.memory_space<vmem>>, vector<200x896xbf16>
    %c0_1 = arith.constant 0 : index
    %c0_2 = arith.constant 0 : index
    %1 = vector.load %arg2[%c0_1, %c0_2] : memref<896x256xbf16, #tpu.memory_space<vmem>>, vector<896x256xbf16>
    %cst = arith.constant dense<0.000000e+00> : vector<200x256xf32>
    %2 = tpu.matmul %0, %1, %cst {dimension_numbers = #tpu.dot_dimension_numbers<[1], [0], [0], [1], [0, 0, 1, 1], [], []>} : vector<200x896xbf16>, vector<896x256xbf16>, vector<200x256xf32> -> vector<200x256xf32>
    %c0_3 = arith.constant 0 : index
    %c0_4 = arith.constant 0 : index
    %3 = vector.load %arg3[%c0_3, %c0_4] : memref<1x256xf32, #tpu.memory_space<vmem>>, vector<1x256xf32>
    %4 = vector.broadcast %3 : vector<1x256xf32> to vector<200x256xf32>
    %5 = arith.mulf %2, %4 : vector<200x256xf32>
    %c0_5 = arith.constant 0 : index
    %c0_6 = arith.constant 0 : index
    %6 = vector.load %arg4[%c0_5, %c0_6] : memref<1x256xf32, #tpu.memory_space<vmem>>, vector<1x256xf32>
    %7 = vector.broadcast %6 : vector<1x256xf32> to vector<200x256xf32>
    %8 = arith.addf %5, %7 : vector<200x256xf32>
    %c0_7 = arith.constant 0 : index
    %c0_8 = arith.constant 0 : index
    %9 = vector.load %arg5[%c0_7, %c0_8] : memref<200x256xf32, #tpu.memory_space<vmem>>, vector<200x256xf32>
    tpu.vector_store %arg5[%c0_7, %c0_8], %8 {strides = array<i32>} : memref<200x256xf32, #tpu.memory_space<vmem>>, vector<200x256xf32>,
    return
  }
  func.func @transform_0(%arg0: i32) -> (i32, i32) {
    %c0_i32 = arith.constant 0 : i32
    %c0_i32_0 = arith.constant 0 : i32
    %c0_i32_1 = arith.constant 0 : i32
    return %c0_i32, %c0_i32_0 : i32, i32
  }
  func.func @transform_1(%arg0: i32) -> (i32, i32) {
    %c0_i32 = arith.constant 0 : i32
    %c0_i32_0 = arith.constant 0 : i32
    return %c0_i32, %arg0 : i32, i32
  }
  func.func @transform_2(%arg0: i32) -> (i32, i32) {
    %c0_i32 = arith.constant 0 : i32
    %c0_i32_0 = arith.constant 0 : i32
    return %c0_i32, %arg0 : i32, i32
  }
  func.func @transform_3(%arg0: i32) -> (i32, i32) {
    %c0_i32 = arith.constant 0 : i32
    %c0_i32_0 = arith.constant 0 : i32
    return %c0_i32, %arg0 : i32, i32
  }
  func.func @transform_4(%arg0: i32) -> (i32, i32) {
    %c0_i32 = arith.constant 0 : i32
    %c0_i32_0 = arith.constant 0 : i32
    return %c0_i32, %arg0 : i32, i32
  }
}

</mosaic_0001>

<bundles_post_ra>
// kernel: tpu_custom_call.1
= control target key start
LH: loop header
LB: loop body
LE: loop exit
PB: predicated region body
PF: predicated region fallthrough
CT: control target
= control target key end

     0   :  { %s4058_s0 = inlined_call_operand.hbm [shape: bf16[200,896], index: 0, kind: input, shape index: {}]   ;;  %s4059_s1 = inlined_call_operand.hbm [shape: bf16[896,1024], index: 1, kind: input, shape index: {}]   ;;  %s4060_s2 = inlined_call_operand.hbm [shape: f32[1,1024], index: 2, kind: input, shape index: {}]   ;;  %s4061_s3 = inlined_call_operand.hbm [shape: f32[1,1024], index: 3, kind: input, shape index: {}]   ;;  %s4062_s4 = inlined_call_operand.hbm [shape: f32[200,1024], index: 4, kind: output, shape index: {}]  }
   0x1   :  { %4075 = sst [smem:[#allocation17_spill]] %s4059_s1 }
   0x2   :  { %9 = vsyncpa [#allocation3], 0 }
   0x3   :  { %10 = vsyncpa [#allocation6], 0 }
   0x4   :  { %12 = vsyncpa [#allocation6 + $0x1], 0 }
   0x5   :  { %13 = vsyncpa [#allocation9], 0 }
   0x6   :  { %15 = vsyncpa [#allocation9 + $0x1], 0 }
   0x7   :  { %16 = vsyncpa [#allocation4], 0 }
   0x8   :  { %18 = vsyncpa [#allocation4 + $0x1], 0  ;;  %s3486_s15 = smov 0   ;;  %s3488_s16 = smov 0  }
   0x9   :  { %s3490_s17 = smov 0   ;;  %s3492_s18 = smov 0  }
   0xa LB: > { %4076 = sst [smem:[#allocation15_spill]] %s3441_s17  ;;  %s3507_s19 = sadd.s32 1, %s3445_s18   ;;  %s3445_s18 = sphi %s3492_s18, %s4102_s18   ;;  %s3441_s17 = sphi %s3490_s17, %s4099_s17   ;;  %s3437_s16 = sphi %s3488_s16, %s4101_s16   ;;  %s3433_s15 = sphi %s3486_s15, %s4100_s15  }
   0xb   : > { %s52_s20 = sadd.s32 1, %s3441_s17  ;;  %s49_s21 = ssub.s32 %s3445_s18, %s3507_s19 }
   0xc   : > { %p4063_p0 = scmp.ne.s32.totalorder %s3441_s17, %s3437_s16  ;;  %p50_p1 = scmp.eq.s32.totalorder %s49_s21, 0 }
   0xd   : > { %p60_p2 = scmp.eq.s32.totalorder %s3445_s18, 0  ;;  %p2913_p3 = scmp.lt.s32.totalorder %s3445_s18, 4 }
   0xe   : > { %s3517_s22 = scalar_select %p50_p1, %s3441_s17, %s52_s20  }
   0xf   : > { %p61_p4 = por %p60_p2, %p4063_p0  ;;  %s180_s23 = sand.u32 1, %s3445_s18  }
  0x10   : > { %4077 = sst [smem:[#allocation16_spill]] %s3517_s22  ;;  %s3524_s24 = sand.u32 1, %s3441_s17  }
  0x11   : > { %s2879_s25 = smul.u32 896, %s3524_s24  ;;  %s2721_s26 = sshll.u32 %s3445_s18, 7 }
  0x12   : > { %s4078_s1 = sld [smem:[#allocation17_spill]]  ;;  %p3533_p5 = pnand %p2913_p3, %p61_p4 }
  0x13   : > { %s184_s5 = scalar_lea.vmem [#allocation5], %s2879_s25  ;;  %s3539_s7 = scalar_lea.sflag [#allocation6], %s180_s23 }
  0x14   : > { %s4079_s30 = scalar_select %p3533_p5, 1, 0 }
  0x15   : > { %s191_s6 = sshll.u32 %s184_s5, 4  ;;  %p3545_p7 = pneg %p3533_p5  ;;  %s3537_s6 = int_to_ptr.vmem [resolvable:$true] %s191_s6 }
  0x17   : > { %s4080_s9 = scalar_select %p3545_p7, 1, 0 }
  0x18   : > { %s3531_s29 = scalar_lea.hbm %s4078_s1, %s2721_s26  ;;  %s3258_s12 = scalar_lea.hbm %s4078_s1, 57344 }
  0x19   : > { %s3253_s8 = scalar_lea.hbm %s3531_s29, 14336  ;;  %p3259_p10 = scmp.lt.u32.totalorder %s3531_s29, %s4078_s1 }
  0x1a   : > { %p3254_p6 = scmp.ne.s32.totalorder %s3531_s29, %s3253_s8  ;;  %p3260_p11 = scmp.lt.u32.totalorder %s3258_s12, %s3253_s8 }
  0x1b   : > { %p3262_p13 = scmp.lt.u32.totalorder %s3253_s8, %s3531_s29 }
  0x1c   : > { %p3256_p8 = pnand %p3545_p7, %p3254_p6  ;;  %p3261_p12 = por %p3260_p11, %p3259_p10 }
  0x1e   : > { %p3257_p9 = pneg %p3256_p8  ;;  %p3263_p1 = por %p3262_p13, %p3261_p12 }
  0x20   : > { %p3264_p2 = pnand %p3263_p1, %p3257_p9 }
  0x22   : > { %3267 = shalt.err (!%p3264_p2)
}
  0x23   : > { %s3268_s20 = scalar_lea.vmem %s3537_s6, 14336  ;;  %s3447_s21 = smov [#allocation5]  }
  0x24   : > { %p3269_p3 = scmp.ne.s32.totalorder %s3537_s6, %s3268_s20  ;;  %s3273_s23 = sshll.u32 %s3447_s21, 4  ;;  %s3274_s23 = int_to_ptr.vmem [resolvable:$false] %s3273_s23 }
  0x25   : > { %s3275_s25 = scalar_lea.vmem %s3274_s23, 28672  ;;  %p3276_p8 = scmp.lt.s32.totalorder %s3537_s6, %s3274_s23 }
  0x26   : > { %p3271_p4 = pnand %p3269_p3, %p3545_p7  ;;  %p3277_p0 = scmp.lt.s32.totalorder %s3275_s25, %s3268_s20 }
  0x28   : > { %p3272_p6 = pneg %p3271_p4  ;;  %p3278_p10 = por %p3277_p0, %p3276_p8 }
  0x2a   : > { %p3279_p11 = pnand %p3278_p10, %p3272_p6 }
  0x2c   : > { %3282 = shalt.err (!%p3279_p11)
}
  0x2d   : > { %s3448_s26 = smov 512   ;;  %s3449_s27 = smov 128  }
  0x2e   : > { %s3450_s28 = smov 8   ;;  %s3570_s5 = sadd.s32 4294967295, %s3445_s18  }
  0x2f   : > { %2901 = dma.hbm_to_vmem [thread:$0]  (!%p3533_p5), %s3531_s29, 14336, %s3537_s6, %s3539_s7, %s3448_s26, %s3449_s27, %s3450_s28  }
  0x30   : > { %s2498_s8 = sadd.s32 4294967294, %s3445_s18   ;;  %p65_p0 = scmp.ne.s32.totalorder %s3437_s16, %s3433_s15 }
  0x31   : > { %p4065_p9 = scmp.eq.s32.totalorder %s3570_s5, 0  ;;  %p141_p12 = scmp.eq.s32.totalorder %s3570_s5, 3 }
  0x32   : > { %p147_p13 = scmp.eq.s32.totalorder %s2498_s8, 3  ;;  %p2499_p1 = scmp.ge.s32.totalorder %s3445_s18, 1 }
  0x33   : > { %p3580_p2 = por %p4065_p9, %p65_p0  ;;  %p4082_p3 = scmp.ne.s32.totalorder %s3441_s17, %s3437_s16 }
  0x34   : > { %p3591_p6 = por %p147_p13, %p65_p0  ;;  %p154_p8 = scmp.lt.s32.totalorder %s3445_s18, 5 }
  0x35   : > { %s4081_s10 = scalar_select %p3580_p2, 1, 0 }
  0x36   : > { %p3587_p4 = por %p141_p12, %p4082_p3  ;;  %p3596_p10 = pnand %p2499_p1, %p154_p8 }
  0x37   : > { %s4084_s6 = scalar_select %p3591_p6, 1, 0 }
  0x38   : > { %s4083_s29 = scalar_select %p3587_p4, 1, 0 }
  0x39   : > { %s4085_s11 = scalar_select %p3596_p10, 1, 0 }
  0x3a   : > { %s3451_s12 = smov [#allocation2]   ;;  %p2894_p11 = pneg %p3596_p10 }
  0x3b   : > { %s166_s13 = sshll.u32 %s3451_s12, 4  ;;  %s4073_s14 = sshll.u32 %s3524_s24, 1  ;;  %s3600_s13 = int_to_ptr.vmem [resolvable:$true] %s166_s13 }
  0x3c   : > { %s4074_s20 = sshll.u32 %s3445_s18, 5  ;;  %p3608_p12 = pnand %p2894_p11, %p4065_p9 }
  0x3d   : > { %s3617_s26 = scalar_lea.hbm %s4060_s2, %s4074_s20  ;;  %s205_s27 = scalar_lea.vmem [#allocation7], %s4073_s14 }
  0x3e   : > { %s213_s28 = sshll.u32 %s205_s27, 4  ;;  %s3283_s1 = scalar_lea.hbm %s4058_s0, 11200  ;;  %s3621_s28 = int_to_ptr.vmem [resolvable:$true] %s213_s28 }
  0x3f   : > { %p3284_p0 = scmp.ne.s32.totalorder %s4058_s0, %s3283_s1  ;;  %p3285_p13 = pneg %p3608_p12 }
  0x40   : > { %p3290_p8 = scmp.lt.u32.totalorder %s3283_s1, %s4058_s0 }
  0x41   : > { %p3286_p1 = pnand %p3285_p13, %p3284_p0 }
  0x43   : > { %p3287_p3 = pneg %p3286_p1 }
  0x45   : > { %p3292_p11 = pnand %p3290_p8, %p3287_p3 }
  0x47   : > { %3295 = shalt.err (!%p3292_p11)
}
  0x48   : > { %s3296_s27 = scalar_lea.vmem %s3600_s13, 11200  ;;  %p3304_p2 = scmp.lt.s32.totalorder %s3600_s13, %s3600_s13 }
  0x49   : > { %p3297_p9 = scmp.ne.s32.totalorder %s3600_s13, %s3296_s27  ;;  %p3305_p10 = scmp.lt.s32.totalorder %s3296_s27, %s3296_s27 }
  0x4b   : > { %p3299_p6 = pnand %p3297_p9, %p3285_p13  ;;  %p3306_p5 = por %p3305_p10, %p3304_p2 }
  0x4d   : > { %p3300_p4 = pneg %p3299_p6 }
  0x4f   : > { %p3307_p7 = pnand %p3306_p5, %p3300_p4 }
  0x51   : > { %3310 = shalt.err (!%p3307_p7)
}
  0x52   : > { %s3452_s17 = smov 448   ;;  %s3453_s1 = smov 28  }
  0x53   : > { %2897 = dma.hbm_to_vmem [thread:$0]  (!%p3608_p12), %s4058_s0, 11200, %s3600_s13, [#allocation3], %s3452_s17, %s3452_s17, %s3453_s1  }
  0x54   : > { %s3311_s12 = scalar_lea.hbm %s3617_s26, 32  ;;  %p4087_p6 = scmp.ne.s32.totalorder %s4080_s9, 0 }
  0x55   : > { %p3312_p9 = scmp.ne.s32.totalorder %s3617_s26, %s3311_s12  ;;  %s3316_s27 = scalar_lea.hbm %s4060_s2, 128 }
  0x56   : > { %p3317_p7 = scmp.lt.u32.totalorder %s3617_s26, %s4060_s2  ;;  %p3318_p4 = scmp.lt.u32.totalorder %s3316_s27, %s3311_s12 }
  0x57   : > { %p3314_p2 = pnand %p3312_p9, %p4087_p6  ;;  %p3320_p0 = scmp.lt.u32.totalorder %s3311_s12, %s3617_s26 }
  0x58   : > { %p3319_p10 = por %p3318_p4, %p3317_p7 }
  0x59   : > { %p3315_p5 = pneg %p3314_p2 }
  0x5a   : > { %p3321_p13 = por %p3320_p0, %p3319_p10 }
  0x5c   : > { %p3322_p1 = pnand %p3321_p13, %p3315_p5 }
  0x5e   : > { %3325 = shalt.err (!%p3322_p1)
}
  0x5f   : > { %s3326_s13 = scalar_lea.vmem %s3621_s28, 32  ;;  %s3454_s21 = smov [#allocation7]  }
  0x60   : > { %p3327_p12 = scmp.ne.s32.totalorder %s3621_s28, %s3326_s13  ;;  %s3331_s17 = sshll.u32 %s3454_s21, 4  ;;  %s3332_s17 = int_to_ptr.vmem [resolvable:$false] %s3331_s17 }
  0x61   : > { %s3333_s14 = scalar_lea.vmem %s3332_s17, 64  ;;  %p3334_p11 = scmp.lt.s32.totalorder %s3621_s28, %s3332_s17 }
  0x62   : > { %p3329_p3 = pnand %p3327_p12, %p4087_p6  ;;  %p3335_p9 = scmp.lt.s32.totalorder %s3333_s14, %s3326_s13 }
  0x64   : > { %p3330_p8 = pneg %p3329_p3  ;;  %p3336_p2 = por %p3335_p9, %p3334_p11 }
  0x66   : > { %p3337_p7 = pnand %p3336_p2, %p3330_p8 }
  0x68   : > { %3340 = shalt.err (!%p3337_p7)
}
  0x69   : > { %p4088_p5 = scmp.ne.s32.totalorder %s4079_s30, 0  ;;  %s4089_s20 = sshll.u32 %s3445_s18, 5 }
  0x6a   : > { %s3671_s8 = scalar_lea.hbm %s4061_s3, %s4089_s20  ;;  %s4090_s12 = sshll.u32 %s3524_s24, 1 }
  0x6b   : > { %2904 = dma.hbm_to_vmem [thread:$0]  (!%p4088_p5), %s3617_s26, 32, %s3621_s28, %s3539_s7  }
  0x6c   : > { %s224_s23 = scalar_lea.vmem [#allocation8], %s4090_s12  ;;  %s221_s27 = scalar_lea.sflag [#allocation9], %s3524_s24 }
  0x6d   : > { %s232_s25 = sshll.u32 %s224_s23, 4  ;;  %s3341_s13 = scalar_lea.hbm %s3671_s8, 32  ;;  %s233_s25 = int_to_ptr.vmem [resolvable:$true] %s232_s25 }
  0x6e   : > { %p3342_p4 = scmp.ne.s32.totalorder %s3671_s8, %s3341_s13  ;;  %s3346_s28 = scalar_lea.hbm %s4061_s3, 128 }
  0x6f   : > { %p3347_p13 = scmp.lt.u32.totalorder %s3671_s8, %s4061_s3  ;;  %p3348_p1 = scmp.lt.u32.totalorder %s3346_s28, %s3341_s13 }
  0x70   : > { %p3344_p10 = pnand %p3342_p4, %p4087_p6  ;;  %p3350_p3 = scmp.lt.u32.totalorder %s3341_s13, %s3671_s8 }
  0x71   : > { %p3349_p12 = por %p3348_p1, %p3347_p13 }
  0x72   : > { %p3345_p0 = pneg %p3344_p10 }
  0x73   : > { %p3351_p8 = por %p3350_p3, %p3349_p12 }
  0x75   : > { %p3352_p11 = pnand %p3351_p8, %p3345_p0 }
  0x77   : > { %3355 = shalt.err (!%p3352_p11)
}
  0x78   : > { %s3356_s24 = scalar_lea.vmem %s233_s25, 32  ;;  %s3455_s14 = smov [#allocation8]  }
  0x79   : > { %p3357_p9 = scmp.ne.s32.totalorder %s233_s25, %s3356_s24  ;;  %s3361_s20 = sshll.u32 %s3455_s14, 4  ;;  %s3362_s20 = int_to_ptr.vmem [resolvable:$false] %s3361_s20 }
  0x7a   : > { %s3363_s1 = scalar_lea.vmem %s3362_s20, 64  ;;  %p3364_p4 = scmp.lt.s32.totalorder %s233_s25, %s3362_s20 }
  0x7b   : > { %p3359_p2 = pnand %p3357_p9, %p4087_p6  ;;  %p3365_p10 = scmp.lt.s32.totalorder %s3363_s1, %s3356_s24 }
  0x7d   : > { %p3360_p7 = pneg %p3359_p2  ;;  %p3366_p5 = por %p3365_p10, %p3364_p4 }
  0x7f   : > { %p3367_p1 = pnand %p3366_p5, %p3360_p7 }
  0x81   : > { %3370 = shalt.err (!%p3367_p1)
}
  0x82   : > { %p4091_p13 = scmp.ne.s32.totalorder %s4079_s30, 0  ;;  %p4092_p0 = scmp.ne.s32.totalorder %s4085_s11, 0 }
  0x83   : > { %p4093_p12 = scmp.eq.s32.totalorder (!%p4092_p0), %s3570_s5, 0 }
  0x84   : > { %2907 = dma.hbm_to_vmem [thread:$0]  (!%p4091_p13), %s3671_s8, 32, %s233_s25, %s221_s27  }
  0x85   : > { %241 = sbr.rel (%p4092_p0) target bundleno = 650 (0x28a), region = 36 }
  0x8c   : > { %3416 = dma.done.wait (%p4093_p12), [#allocation3], 11200   ;;  %p4094_p6 = pmov %p4093_p12 }
  0x8d   : > { %s247_s9 = sand.u32 1, %s3570_s5   ;;  %s3701_s22 = sand.u32 1, %s3437_s16  }
  0x8e   : > { %3418 = vsyncadd (%p4094_p6), [#allocation3], 4294956096  ;;  %s2880_s12 = smul.u32 896, %s3701_s22  ;;  %s248_s30 = scalar_lea.sflag [#allocation6], %s247_s9 }
  0x8f   : > { %p4095_p5 = scmp.ne.s32.totalorder %s4081_s10, 0 }
  0x90   : > { %s3704_s23 = scalar_lea.vmem [#allocation5], %s2880_s12 }
  0x91   : > { %3420 = dma.done.wait (%p4095_p5), %s248_s30, 14368  }
  0x92   : > { %3422 = vsyncadd (%p4095_p5), %s248_s30, 4294952928  ;;  %s2512_s11 = sshll.u32 %s3701_s22, 1  ;;  %s266_s25 = scalar_lea.sflag [#allocation9], %s3701_s22 }
  0x93   : > { %s3711_s8 = scalar_lea.vmem [#allocation7], %s2512_s11  ;;  %s3714_s27 = scalar_lea.vmem [#allocation8], %s2512_s11 }
  0x94   : > { %3424 = dma.done.wait (%p4095_p5), %s266_s25, 32  }
  0x95   : > { %3426 = vsyncadd (%p4095_p5), %s266_s25, 4294967264  ;;  %v2958_v0 = vld [vmem:[%s3704_s23 + $0x4] ss:$8 sps:$4 sm:$0xff]   ;;  %v2962_v2 = vld [vmem:[%s3704_s23] ss:$8 sps:$4 sm:$0xff]   ;;  %s2881_s10 = smul.u32 400, %s3701_s22 }
  0x96   : > { %v2960_v1 = vld [vmem:[%s3704_s23 + $0x204] ss:$8 sps:$4 sm:$0xff]   ;;  %1538 = vmatprep.subr.bf16.mxu1 %v2958_v0  ;;  %v2963_v3 = vld [vmem:[%s3704_s23 + $0x200] ss:$8 sps:$4 sm:$0xff]   ;;  %v2964_v4 = vld [vmem:[%s3704_s23 + $0x14] ss:$8 sps:$4 sm:$0xff]  }
  0x97   : > { %1860 = vmatprep.subr.bf16.mxu0 %v2960_v1  ;;  %1539 = vmatpush1.bf16.msra.mxu1 %v2962_v2  ;;  %v2966_v5 = vld [vmem:[%s3704_s23 + $0x214] ss:$8 sps:$4 sm:$0xff]   ;;  %v2968_v6 = vld [vmem:[%s3704_s23 + $0x10] ss:$8 sps:$4 sm:$0xff]   ;;  %v2970_v8 = vld [vmem:[%s3704_s23 + $0x24] ss:$8 sps:$4 sm:$0xff]  }
  0x98   : > { %1861 = vmatpush1.bf16.msra.mxu0 %v2963_v3  ;;  %1540 = vmatprep.subr.bf16.mxu1 %v2964_v4  ;;  %v2969_v7 = vld [vmem:[%s3704_s23 + $0x210] ss:$8 sps:$4 sm:$0xff]   ;;  %v2972_v9 = vld [vmem:[%s3704_s23 + $0x224] ss:$8 sps:$4 sm:$0xff]   ;;  %v2974_v10 = vld [vmem:[%s3704_s23 + $0x20] ss:$8 sps:$4 sm:$0xff]  }
  0x99   : > { %1862 = vmatprep.subr.bf16.mxu0 %v2966_v5  ;;  %v2975_v11 = vld [vmem:[%s3704_s23 + $0x220] ss:$8 sps:$4 sm:$0xff]   ;;  %v2976_v12 = vld [vmem:[%s3704_s23 + $0x34] ss:$8 sps:$4 sm:$0xff]   ;;  %v2980_v14 = vld [vmem:[%s3704_s23 + $0x30] ss:$8 sps:$4 sm:$0xff]  }
  0x9a   : > { %v2978_v13 = vld [vmem:[%s3704_s23 + $0x234] ss:$8 sps:$4 sm:$0xff]   ;;  %v2981_v15 = vld [vmem:[%s3704_s23 + $0x230] ss:$8 sps:$4 sm:$0xff]   ;;  %v2982_v16 = vld [vmem:[%s3704_s23 + $0x44] ss:$8 sps:$4 sm:$0xff]  }
  0x9b   : > { %1541 = vmatpush1.bf16.msra.mxu1 %v2968_v6  ;;  %v2984_v17 = vld [vmem:[%s3704_s23 + $0x244] ss:$8 sps:$4 sm:$0xff]   ;;  %v2986_v18 = vld [vmem:[%s3704_s23 + $0x40] ss:$8 sps:$4 sm:$0xff]   ;;  %v2988_v20 = vld [vmem:[%s3704_s23 + $0x54] ss:$8 sps:$4 sm:$0xff]  }
  0x9c   : > { %1863 = vmatpush1.bf16.msra.mxu0 %v2969_v7  ;;  %1542 = vmatprep.subr.bf16.mxu1 %v2970_v8  ;;  %v2987_v19 = vld [vmem:[%s3704_s23 + $0x240] ss:$8 sps:$4 sm:$0xff]   ;;  %v2990_v21 = vld [vmem:[%s3704_s23 + $0x254] ss:$8 sps:$4 sm:$0xff]   ;;  %v2992_v22 = vld [vmem:[%s3704_s23 + $0x50] ss:$8 sps:$4 sm:$0xff]  }
  0x9d   : > { %1864 = vmatprep.subr.bf16.mxu0 %v2972_v9  ;;  %v2993_v23 = vld [vmem:[%s3704_s23 + $0x250] ss:$8 sps:$4 sm:$0xff]   ;;  %v2994_v24 = vld [vmem:[%s3704_s23 + $0x64] ss:$8 sps:$4 sm:$0xff]   ;;  %v2998_v26 = vld [vmem:[%s3704_s23 + $0x60] ss:$8 sps:$4 sm:$0xff]  }
  0x9e   : > { %v2996_v25 = vld [vmem:[%s3704_s23 + $0x264] ss:$8 sps:$4 sm:$0xff]   ;;  %v2999_v27 = vld [vmem:[%s3704_s23 + $0x260] ss:$8 sps:$4 sm:$0xff]   ;;  %v3000_v28 = vld [vmem:[%s3704_s23 + $0x74] ss:$8 sps:$4 sm:$0xff]  }
  0x9f   : > { %1543 = vmatpush1.bf16.msra.mxu1 %v2974_v10  ;;  %v3002_v29 = vld [vmem:[%s3704_s23 + $0x274] ss:$8 sps:$4 sm:$0xff]   ;;  %v3004_v30 = vld [vmem:[%s3704_s23 + $0x70] ss:$8 sps:$4 sm:$0xff]   ;;  %v3006_v32 = vld [vmem:[%s3704_s23 + $0x84] ss:$8 sps:$4 sm:$0xff]  }
  0xa0   : > { %1865 = vmatpush1.bf16.msra.mxu0 %v2975_v11  ;;  %1544 = vmatprep.subr.bf16.mxu1 %v2976_v12  ;;  %v3005_v31 = vld [vmem:[%s3704_s23 + $0x270] ss:$8 sps:$4 sm:$0xff]   ;;  %v3008_v33 = vld [vmem:[%s3704_s23 + $0x284] ss:$8 sps:$4 sm:$0xff]   ;;  %v3010_v34 = vld [vmem:[%s3704_s23 + $0x80] ss:$8 sps:$4 sm:$0xff]  }
  0xa1   : > { %1866 = vmatprep.subr.bf16.mxu0 %v2978_v13  ;;  %v3011_v35 = vld [vmem:[%s3704_s23 + $0x280] ss:$8 sps:$4 sm:$0xff]   ;;  %v3012_v36 = vld [vmem:[%s3704_s23 + $0x94] ss:$8 sps:$4 sm:$0xff]   ;;  %v3016_v38 = vld [vmem:[%s3704_s23 + $0x90] ss:$8 sps:$4 sm:$0xff]  }
  0xa2   : > { %v3014_v37 = vld [vmem:[%s3704_s23 + $0x294] ss:$8 sps:$4 sm:$0xff]   ;;  %v3017_v39 = vld [vmem:[%s3704_s23 + $0x290] ss:$8 sps:$4 sm:$0xff]   ;;  %v3018_v40 = vld [vmem:[%s3704_s23 + $0xa4] ss:$8 sps:$4 sm:$0xff]  }
  0xa3   : > { %1545 = vmatpush1.bf16.msra.mxu1 %v2980_v14  ;;  %v3020_v41 = vld [vmem:[%s3704_s23 + $0x2a4] ss:$8 sps:$4 sm:$0xff]   ;;  %v3022_v42 = vld [vmem:[%s3704_s23 + $0xa0] ss:$8 sps:$4 sm:$0xff]   ;;  %v3024_v44 = vld [vmem:[%s3704_s23 + $0xb4] ss:$8 sps:$4 sm:$0xff]  }
  0xa4   : > { %1867 = vmatpush1.bf16.msra.mxu0 %v2981_v15  ;;  %1546 = vmatprep.subr.bf16.mxu1 %v2982_v16  ;;  %v3023_v43 = vld [vmem:[%s3704_s23 + $0x2a0] ss:$8 sps:$4 sm:$0xff]   ;;  %v3026_v45 = vld [vmem:[%s3704_s23 + $0x2b4] ss:$8 sps:$4 sm:$0xff]   ;;  %v3028_v46 = vld [vmem:[%s3704_s23 + $0xb0] ss:$8 sps:$4 sm:$0xff]  }
  0xa5   : > { %1868 = vmatprep.subr.bf16.mxu0 %v2984_v17  ;;  %v3029_v47 = vld [vmem:[%s3704_s23 + $0x2b0] ss:$8 sps:$4 sm:$0xff]   ;;  %v3030_v48 = vld [vmem:[%s3704_s23 + $0xc4] ss:$8 sps:$4 sm:$0xff]   ;;  %v3034_v52 = vld [vmem:[%s3704_s23 + $0xc0] ss:$8 sps:$4 sm:$0xff]  }
  0xa6   : > { %v3056_v49 = vld [vmem:[#allocation2 + $0x4] ss:$28 sps:$4 sm:$0xff]   ;;  %v3059_v51 = vld [vmem:[#allocation2 + $0x14] ss:$28 sps:$4 sm:$0xff]   ;;  %v3066_v8 = vld [vmem:[#allocation2 + $0x3c] ss:$28 sps:$4 sm:$0xff]  }
  0xa7   : > { %1547 = vmatpush1.bf16.msra.mxu1 %v2986_v18  ;;  %v3032_v50 = vld [vmem:[%s3704_s23 + $0x2c4] ss:$8 sps:$4 sm:$0xff]   ;;  %1570 = vmatprep.mubr.bf16.mxu1 %v3056_v49  ;;  %v3035_v53 = vld [vmem:[%s3704_s23 + $0x2c0] ss:$8 sps:$4 sm:$0xff]   ;;  %v3036_v54 = vld [vmem:[%s3704_s23 + $0xd4] ss:$8 sps:$4 sm:$0xff]  }
  0xa8   : > { %1869 = vmatpush1.bf16.msra.mxu0 %v2987_v19  ;;  %1548 = vmatprep.subr.bf16.mxu1 %v2988_v20  ;;  %v3038_v55 = vld [vmem:[%s3704_s23 + $0x2d4] ss:$8 sps:$4 sm:$0xff]   ;;  %v3040_v56 = vld [vmem:[%s3704_s23 + $0xd0] ss:$8 sps:$4 sm:$0xff]   ;;  %v3042_v58 = vld [vmem:[%s3704_s23 + $0xe4] ss:$8 sps:$4 sm:$0xff]  }
  0xa9   : > { %1870 = vmatprep.subr.bf16.mxu0 %v2990_v21  ;;  %1892 = vmatprep.mubr.bf16.mxu0 %v3059_v51  ;;  %v3041_v57 = vld [vmem:[%s3704_s23 + $0x2d0] ss:$8 sps:$4 sm:$0xff]   ;;  %v3044_v59 = vld [vmem:[%s3704_s23 + $0x2e4] ss:$8 sps:$4 sm:$0xff]   ;;  %v3046_v60 = vld [vmem:[%s3704_s23 + $0xe0] ss:$8 sps:$4 sm:$0xff]  }
  0xaa   : > { %v3047_v61 = vld [vmem:[%s3704_s23 + $0x2e0] ss:$8 sps:$4 sm:$0xff]   ;;  %v3048_v62 = vld [vmem:[%s3704_s23 + $0xf4] ss:$8 sps:$4 sm:$0xff]   ;;  %v3052_v0 = vld [vmem:[%s3704_s23 + $0xf0] ss:$8 sps:$4 sm:$0xff]  }
  0xab   : > { %1549 = vmatpush1.bf16.msra.mxu1 %v2992_v22  ;;  %v3050_v63 = vld [vmem:[%s3704_s23 + $0x2f4] ss:$8 sps:$4 sm:$0xff]   ;;  %v3053_v1 = vld [vmem:[%s3704_s23 + $0x2f0] ss:$8 sps:$4 sm:$0xff]   ;;  %v3062_v2 = vld [vmem:[%s3704_s23 + $0x104] ss:$8 sps:$4 sm:$0xff]  }
  0xac   : > { %1871 = vmatpush1.bf16.msra.mxu0 %v2993_v23  ;;  %1550 = vmatprep.subr.bf16.mxu1 %v2994_v24  ;;  %v3065_v3 = vld [vmem:[%s3704_s23 + $0x304] ss:$8 sps:$4 sm:$0xff]   ;;  %v3057_v5 = vld [vmem:[#allocation2 + $0x10] ss:$28 sps:$4 sm:$0xff]   ;;  %v3060_v6 = vld [vmem:[%s3704_s23 + $0x100] ss:$8 sps:$4 sm:$0xff]  }
  0xad   : > { %1872 = vmatprep.subr.bf16.mxu0 %v2996_v25  ;;  %v3054_v4 = vld [vmem:[#allocation2] ss:$28 sps:$4 sm:$0xff]   ;;  %v3070_v9 = vld [vmem:[%s3704_s23 + $0x114] ss:$8 sps:$4 sm:$0xff]   ;;  %v3071_v10 = vld [vmem:[#allocation2 + $0x4c] ss:$28 sps:$4 sm:$0xff]  }
  0xae   : > { %v3063_v7 = vld [vmem:[%s3704_s23 + $0x300] ss:$8 sps:$4 sm:$0xff]   ;;  %v3080_v11 = vld [vmem:[%s3704_s23 + $0x314] ss:$8 sps:$4 sm:$0xff]   ;;  %v3068_v12 = vld [vmem:[%s3704_s23 + $0x110] ss:$8 sps:$4 sm:$0xff]  }
  0xaf   : > { %1551 = vmatpush1.bf16.msra.mxu1 %v2998_v26  ;;  %v3077_v13 = vld [vmem:[%s3704_s23 + $0x124] ss:$8 sps:$4 sm:$0xff]   ;;  %v3078_v14 = vld [vmem:[%s3704_s23 + $0x310] ss:$8 sps:$4 sm:$0xff]   ;;  %v3075_v18 = vld [vmem:[%s3704_s23 + $0x120] ss:$8 sps:$4 sm:$0xff]  }
  0xb0   : > { %1873 = vmatpush1.bf16.msra.mxu0 %v2999_v27  ;;  %1552 = vmatprep.subr.bf16.mxu1 %v3000_v28  ;;  %v3101_v15 = vld [vmem:[%s3704_s23 + $0x324] ss:$8 sps:$4 sm:$0xff]   ;;  %v3073_v16 = vld [vmem:[#allocation2 + $0x38] ss:$28 sps:$4 sm:$0xff]   ;;  %v3099_v22 = vld [vmem:[%s3704_s23 + $0x320] ss:$8 sps:$4 sm:$0xff]  }
  0xb1   : > { %1874 = vmatprep.subr.bf16.mxu0 %v3002_v29  ;;  %v3074_v17 = vld [vmem:[#allocation2 + $0x48] ss:$28 sps:$4 sm:$0xff]   ;;  %v3081_v19 = vld [vmem:[#allocation2 + $0x74] ss:$28 sps:$4 sm:$0xff]   ;;  %v3086_v27 = vld [vmem:[#allocation2 + $0x80] ss:$28 sps:$4 sm:$0xff]  }
  0xb2   : > { %v3083_v20 = vld [vmem:[#allocation2 + $0x84] ss:$28 sps:$4 sm:$0xff]   ;;  %v3089_v21 = vld [vmem:[%s3704_s23 + $0x134] ss:$8 sps:$4 sm:$0xff]   ;;  %v3087_v24 = vld [vmem:[%s3704_s23 + $0x130] ss:$8 sps:$4 sm:$0xff]  }
  0xb3   : > { %1553 = vmatpush1.bf16.msra.mxu1 %v3004_v30  ;;  %v3120_v23 = vld [vmem:[%s3704_s23 + $0x334] ss:$8 sps:$4 sm:$0xff]   ;;  %v3098_v26 = vld [vmem:[%s3704_s23 + $0x144] ss:$8 sps:$4 sm:$0xff]   ;;  %v3118_v28 = vld [vmem:[%s3704_s23 + $0x330] ss:$8 sps:$4 sm:$0xff]  }
  0xb4   : > { %1875 = vmatpush1.bf16.msra.mxu0 %v3005_v31  ;;  %1554 = vmatprep.subr.bf16.mxu1 %v3006_v32  ;;  %v3085_v25 = vld [vmem:[#allocation2 + $0x70] ss:$28 sps:$4 sm:$0xff]   ;;  %v3092_v30 = vld [vmem:[#allocation2 + $0xbc] ss:$28 sps:$4 sm:$0xff]   ;;  %v3137_v32 = vld [vmem:[%s3704_s23 + $0x344] ss:$8 sps:$4 sm:$0xff]  }
  0xb5   : > { %1876 = vmatprep.subr.bf16.mxu0 %v3008_v33  ;;  %v3090_v29 = vld [vmem:[#allocation2 + $0xac] ss:$28 sps:$4 sm:$0xff]   ;;  %v3096_v31 = vld [vmem:[%s3704_s23 + $0x140] ss:$8 sps:$4 sm:$0xff]   ;;  %v3110_v33 = vld [vmem:[%s3704_s23 + $0x154] ss:$8 sps:$4 sm:$0xff]  }
  0xb6   : > { %v3134_v49 = vld [vmem:[%s3704_s23 + $0x184] ss:$8 sps:$4 sm:$0xff]   ;;  %s3862_s13 = scalar_lea.vmem [#allocation10], %s2881_s10  ;;  %s2724_s7 = sshll.u32 %s3570_s5, 8 }
  0xb7   : > { %1555 = vmatpush1.bf16.msra.mxu1 %v3010_v34  ;;  %v3135_v34 = vld [vmem:[%s3704_s23 + $0x340] ss:$8 sps:$4 sm:$0xff]   ;;  %v3173_v51 = vld [vmem:[%s3704_s23 + $0x364] ss:$8 sps:$4 sm:$0xff]   ;;  %s2370_s26 = sshll.u32 %s3862_s13, 4  ;;  %s4009_s17 = scalar_lea.hbm %s4062_s4, %s2724_s7  ;;  %s4012_s26 = int_to_ptr.vmem [resolvable:$true] %s2370_s26 }
  0xb8   : > { %1877 = vmatpush1.bf16.msra.mxu0 %v3011_v35  ;;  %1556 = vmatprep.subr.bf16.mxu1 %v3012_v36  ;;  %v3094_v35 = vld [vmem:[#allocation2 + $0xa8] ss:$28 sps:$4 sm:$0xff]   ;;  %v3095_v36 = vld [vmem:[#allocation2 + $0xb8] ss:$28 sps:$4 sm:$0xff]   ;;  %s2357_s5 = scalar_lea.sflag [#allocation4], %s3701_s22  ;;  %s3371_s24 = scalar_lea.vmem %s4012_s26, 6400 }
  0xb9   : > { %1878 = vmatprep.subr.bf16.mxu0 %v3014_v37  ;;  %v3108_v37 = vld [vmem:[%s3704_s23 + $0x150] ss:$8 sps:$4 sm:$0xff]   ;;  %p3372_p3 = scmp.ne.s32.totalorder %s4012_s26, %s3371_s24  ;;  %p4096_p8 = scmp.ne.s32.totalorder %s4083_s29, 0 }
  0xba   : > { %s3457_s14 = smov [#allocation10]  }
  0xbb   : > { %1557 = vmatpush1.bf16.msra.mxu1 %v3016_v38  ;;  %v3102_v38 = vld [vmem:[#allocation2 + $0xe4] ss:$28 sps:$4 sm:$0xff]   ;;  %p3373_p11 = pnand %p3372_p3, %p4096_p8  ;;  %s3375_s20 = sshll.u32 %s3457_s14, 4  ;;  %s3376_s20 = int_to_ptr.vmem [resolvable:$false] %s3375_s20 }
  0xbc   : > { %1879 = vmatpush1.bf16.msra.mxu0 %v3017_v39  ;;  %1558 = vmatprep.subr.bf16.mxu1 %v3018_v40  ;;  %v3115_v39 = vld [vmem:[%s3704_s23 + $0x164] ss:$8 sps:$4 sm:$0xff]   ;;  %v3104_v40 = vld [vmem:[#allocation2 + $0xf4] ss:$28 sps:$4 sm:$0xff]   ;;  %s3377_s1 = scalar_lea.vmem %s3376_s20, 12800  ;;  %p3378_p2 = scmp.lt.s32.totalorder %s4012_s26, %s3376_s20 }
  0xbd   : > { %1880 = vmatprep.subr.bf16.mxu0 %v3020_v41  ;;  %v3113_v41 = vld [vmem:[%s3704_s23 + $0x160] ss:$8 sps:$4 sm:$0xff]   ;;  %p3374_p9 = pneg %p3373_p11  ;;  %p3379_p7 = scmp.lt.s32.totalorder %s3377_s1, %s3371_s24 }
  0xbf   : > { %1559 = vmatpush1.bf16.msra.mxu1 %v3022_v42  ;;  %v3125_v42 = vld [vmem:[%s3704_s23 + $0x174] ss:$8 sps:$4 sm:$0xff]   ;;  %p3380_p4 = por %p3379_p7, %p3378_p2 }
  0xc0   : > { %1881 = vmatpush1.bf16.msra.mxu0 %v3023_v43  ;;  %1560 = vmatprep.subr.bf16.mxu1 %v3024_v44  ;;  %v3158_v43 = vld [vmem:[%s3704_s23 + $0x354] ss:$8 sps:$4 sm:$0xff]   ;;  %v3156_v44 = vld [vmem:[%s3704_s23 + $0x350] ss:$8 sps:$4 sm:$0xff]  }
  0xc1   : > { %1882 = vmatprep.subr.bf16.mxu0 %v3026_v45  ;;  %v3106_v45 = vld [vmem:[#allocation2 + $0xe0] ss:$28 sps:$4 sm:$0xff]   ;;  %p3381_p10 = pnand %p3380_p4, %p3374_p9 }
  0xc3   : > { %1561 = vmatpush1.bf16.msra.mxu1 %v3028_v46  ;;  %v3107_v46 = vld [vmem:[#allocation2 + $0xf0] ss:$28 sps:$4 sm:$0xff]  }
  0xc4   : > { %1883 = vmatpush1.bf16.msra.mxu0 %v3029_v47  ;;  %1562 = vmatprep.subr.bf16.mxu1 %v3030_v48  ;;  %v3123_v47 = vld [vmem:[%s3704_s23 + $0x170] ss:$8 sps:$4 sm:$0xff]   ;;  %v3111_v48 = vld [vmem:[#allocation2 + $0x11c] ss:$28 sps:$4 sm:$0xff]  }
  0xc5   : > { %1884 = vmatprep.subr.bf16.mxu0 %v3032_v50  ;;  %v3171_v50 = vld [vmem:[%s3704_s23 + $0x360] ss:$8 sps:$4 sm:$0xff]  }
  0xc7   : > { %1563 = vmatpush1.bf16.msra.mxu1 %v3034_v52  ;;  %v3116_v52 = vld [vmem:[#allocation2 + $0x12c] ss:$28 sps:$4 sm:$0xff]  }
  0xc8   : > { %1885 = vmatpush1.bf16.msra.mxu0 %v3035_v53  ;;  %1564 = vmatprep.subr.bf16.mxu1 %v3036_v54  ;;  %v3132_v53 = vld [vmem:[%s3704_s23 + $0x180] ss:$8 sps:$4 sm:$0xff]   ;;  %v3146_v54 = vld [vmem:[%s3704_s23 + $0x194] ss:$8 sps:$4 sm:$0xff]  }
  0xc9   : > { %1886 = vmatprep.subr.bf16.mxu0 %v3038_v55  ;;  %v3144_v55 = vld [vmem:[%s3704_s23 + $0x190] ss:$8 sps:$4 sm:$0xff]  }
  0xcb   : > { %1565 = vmatpush1.bf16.msra.mxu1 %v3040_v56  ;;  %v3121_v56 = vld [vmem:[#allocation2 + $0x118] ss:$28 sps:$4 sm:$0xff]  }
  0xcc   : > { %1887 = vmatpush1.bf16.msra.mxu0 %v3041_v57  ;;  %1566 = vmatprep.subr.bf16.mxu1 %v3042_v58  ;;  %v3155_v57 = vld [vmem:[%s3704_s23 + $0x1a4] ss:$8 sps:$4 sm:$0xff]  }
  0xcd   : > { %1888 = vmatprep.subr.bf16.mxu0 %v3044_v59  ;;  %v3122_v58 = vld [vmem:[#allocation2 + $0x128] ss:$28 sps:$4 sm:$0xff]   ;;  %v3126_v59 = vld [vmem:[#allocation2 + $0x154] ss:$28 sps:$4 sm:$0xff]  }
  0xcf   : > { %1567 = vmatpush1.bf16.msra.mxu1 %v3046_v60  ;;  %v3128_v60 = vld [vmem:[#allocation2 + $0x164] ss:$28 sps:$4 sm:$0xff]  }
  0xd0   : > { %1889 = vmatpush1.bf16.msra.mxu0 %v3047_v61  ;;  %1568 = vmatprep.subr.bf16.mxu1 %v3048_v62  ;;  %v3153_v61 = vld [vmem:[%s3704_s23 + $0x1a0] ss:$8 sps:$4 sm:$0xff]   ;;  %v3166_v62 = vld [vmem:[%s3704_s23 + $0x1b4] ss:$8 sps:$4 sm:$0xff]  }
  0xd1   : > { %1890 = vmatprep.subr.bf16.mxu0 %v3050_v63  ;;  %v3194_v63 = vld [vmem:[%s3704_s23 + $0x374] ss:$8 sps:$4 sm:$0xff]  }
  0xd3   : > { %1569 = vmatpush1.bf16.msra.mxu1 %v3052_v0  ;;  %v3192_v0 = vld [vmem:[%s3704_s23 + $0x370] ss:$8 sps:$4 sm:$0xff]  }
  0xd4   : > { %1891 = vmatpush1.bf16.msra.mxu0 %v3053_v1  ;;  %1699 = vmatprep.subr.bf16.mxu1 %v3062_v2  ;;  %v3130_v1 = vld [vmem:[#allocation2 + $0x150] ss:$28 sps:$4 sm:$0xff]  }
  0xd5   : > { %2021 = vmatprep.subr.bf16.mxu0 %v3065_v3  ;;  %v3164_v2 = vld [vmem:[%s3704_s23 + $0x1b0] ss:$8 sps:$4 sm:$0xff]   ;;  %v3131_v3 = vld [vmem:[#allocation2 + $0x160] ss:$28 sps:$4 sm:$0xff]  }
  0xd6   : > { %1571 = vmatmul.mubr.bf16.vlgmr.msra.gmra.mrb[0].mxu1 %v3054_v4  ;;  %v3170_v4 = vld [vmem:[%s3704_s23 + $0x1c4] ss:$8 sps:$4 sm:$0xff]  }
  0xd7   : > { %1893 = vmatmul.mubr.bf16.vlgmr.msra.gmra.mrb[0].mxu0 %v3057_v5  ;;  %1700 = vmatpush1.bf16.msra.mxu1 %v3060_v6  ;;  %v3138_v5 = vld [vmem:[#allocation2 + $0x18c] ss:$28 sps:$4 sm:$0xff]   ;;  %v3140_v6 = vld [vmem:[#allocation2 + $0x19c] ss:$28 sps:$4 sm:$0xff]  }
  0xd8   : > { %2022 = vmatpush1.bf16.msra.mxu0 %v3063_v7  ;;  %1580 = vmatprep.mubr.bf16.mxu1 %v3066_v8  ;;  %v3168_v7 = vld [vmem:[%s3704_s23 + $0x1c0] ss:$8 sps:$4 sm:$0xff]   ;;  %v3182_v8 = vld [vmem:[%s3704_s23 + $0x1d4] ss:$8 sps:$4 sm:$0xff]  }
  0xd9   : > { %1701 = vmatprep.subr.bf16.mxu1 %v3070_v9  ;;  %1902 = vmatprep.mubr.bf16.mxu0 %v3071_v10  ;;  %v3142_v9 = vld [vmem:[#allocation2 + $0x188] ss:$28 sps:$4 sm:$0xff]   ;;  %v3143_v10 = vld [vmem:[#allocation2 + $0x198] ss:$28 sps:$4 sm:$0xff]  }
  0xda   : > { %2023 = vmatprep.subr.bf16.mxu0 %v3080_v11  ;;  %v3180_v11 = vld [vmem:[%s3704_s23 + $0x1d0] ss:$8 sps:$4 sm:$0xff]  }
  0xdb   : > { %1702 = vmatpush1.bf16.msra.mxu1 %v3068_v12  ;;  %v3191_v12 = vld [vmem:[%s3704_s23 + $0x1e4] ss:$8 sps:$4 sm:$0xff]  }
  0xdc   : > { %2024 = vmatpush1.bf16.msra.mxu0 %v3078_v14  ;;  %1703 = vmatprep.subr.bf16.mxu1 %v3077_v13  ;;  %v3147_v13 = vld [vmem:[#allocation2 + $0x1c4] ss:$28 sps:$4 sm:$0xff]   ;;  %v3149_v14 = vld [vmem:[#allocation2 + $0x1d4] ss:$28 sps:$4 sm:$0xff]  }
  0xdd   : > { %2025 = vmatprep.subr.bf16.mxu0 %v3101_v15  ;;  %v3189_v15 = vld [vmem:[%s3704_s23 + $0x1e0] ss:$8 sps:$4 sm:$0xff]  }
  0xde   : > { %1581 = vmatmul.mubr.bf16.gmra.mrb[4].mxu1 %v3073_v16  ;;  %v3201_v16 = vld [vmem:[%s3704_s23 + $0x1f4] ss:$8 sps:$4 sm:$0xff]  }
  0xdf   : > { %1903 = vmatmul.mubr.bf16.gmra.mrb[4].mxu0 %v3074_v17  ;;  %1704 = vmatpush1.bf16.msra.mxu1 %v3075_v18  ;;  %v3151_v17 = vld [vmem:[#allocation2 + $0x1c0] ss:$28 sps:$4 sm:$0xff]   ;;  %v3199_v18 = vld [vmem:[%s3704_s23 + $0x1f0] ss:$8 sps:$4 sm:$0xff]  }
  0xe0   : > { %1590 = vmatprep.mubr.bf16.mxu1 %v3081_v19  ;;  %1912 = vmatprep.mubr.bf16.mxu0 %v3083_v20  ;;  %v3152_v19 = vld [vmem:[#allocation2 + $0x1d0] ss:$28 sps:$4 sm:$0xff]   ;;  %v3159_v20 = vld [vmem:[#allocation2 + $0x1fc] ss:$28 sps:$4 sm:$0xff]  }
  0xe1   : > { %1705 = vmatprep.subr.bf16.mxu1 %v3089_v21  ;;  %2026 = vmatpush1.bf16.msra.mxu0 %v3099_v22  ;;  %v3161_v21 = vld [vmem:[#allocation2 + $0x20c] ss:$28 sps:$4 sm:$0xff]   ;;  %v3163_v22 = vld [vmem:[#allocation2 + $0x1f8] ss:$28 sps:$4 sm:$0xff]  }
  0xe2   : > { %2027 = vmatprep.subr.bf16.mxu0 %v3120_v23  ;;  %v3167_v23 = vld [vmem:[#allocation2 + $0x208] ss:$28 sps:$4 sm:$0xff]  }
  0xe3   : > { %1706 = vmatpush1.bf16.msra.mxu1 %v3087_v24  ;;  %v3174_v24 = vld [vmem:[#allocation2 + $0x234] ss:$28 sps:$4 sm:$0xff]  }
  0xe4   : > { %1707 = vmatprep.subr.bf16.mxu1 %v3098_v26  ;;  %v3178_v26 = vld [vmem:[#allocation2 + $0x230] ss:$28 sps:$4 sm:$0xff]  }
  0xe5   : > { %2028 = vmatpush1.bf16.msra.mxu0 %v3118_v28  ;;  %v3183_v28 = vld [vmem:[#allocation2 + $0x26c] ss:$28 sps:$4 sm:$0xff]  }
  0xe6   : > { %1591 = vmatmul.mubr.bf16.gmra.mrb[8].mxu1 %v3085_v25  ;;  %2029 = vmatprep.subr.bf16.mxu0 %v3137_v32  ;;  %v3176_v25 = vld [vmem:[#allocation2 + $0x244] ss:$28 sps:$4 sm:$0xff]  }
  0xe7   : > { %1913 = vmatmul.mubr.bf16.gmra.mrb[8].mxu0 %v3086_v27  ;;  %1600 = vmatprep.mubr.bf16.mxu1 %v3090_v29  ;;  %v3179_v27 = vld [vmem:[#allocation2 + $0x240] ss:$28 sps:$4 sm:$0xff]   ;;  %v3187_v32 = vld [vmem:[#allocation2 + $0x268] ss:$28 sps:$4 sm:$0xff]  }
  0xe8   : > { %1922 = vmatprep.mubr.bf16.mxu0 %v3092_v30  ;;  %1708 = vmatpush1.bf16.msra.mxu1 %v3096_v31  ;;  %v3185_v29 = vld [vmem:[#allocation2 + $0x27c] ss:$28 sps:$4 sm:$0xff]   ;;  %v405_v30 = vld [vmem:[#allocation2 + $0x2a0] sm:$0xff]  ;;  %v407_v31 = vld [vmem:[#allocation2 + $0x2b0] sm:$0xff] }
  0xe9   : > { %1709 = vmatprep.subr.bf16.mxu1 %v3110_v33  ;;  %2030 = vmatpush1.bf16.msra.mxu0 %v3135_v34  ;;  %v3188_v33 = vld [vmem:[#allocation2 + $0x278] ss:$28 sps:$4 sm:$0xff]   ;;  %v2599_v34 = vcombine.high %v405_v30, %v405_v30 }
  0xea   : > { %2031 = vmatprep.subr.bf16.mxu0 %v3158_v43  ;;  %v3208_v43 = vld [vmem:[#allocation2 + $0x40] ss:$28 sps:$4 sm:$0xff]  }
  0xec   : > { %1710 = vmatpush1.bf16.msra.mxu1 %v3108_v37  ;;  %v2602_v37 = vcombine.low %v407_v31, %v407_v31 }
  0xed   : > { %1711 = vmatprep.subr.bf16.mxu1 %v3115_v39  ;;  %2032 = vmatpush1.bf16.msra.mxu0 %v3156_v44  ;;  %v3456_v39 = vmov 0   ;;  %v3209_v44 = vld [vmem:[#allocation2 + $0x50] ss:$28 sps:$4 sm:$0xff]  }
  0xee   : > { %1601 = vmatmul.mubr.bf16.gmra.mrb[12].mxu1 %v3094_v35  ;;  %2033 = vmatprep.subr.bf16.mxu0 %v3173_v51  ;;  %v2603_v35 = vcombine.high %v407_v31, %v407_v31  ;;  %v3218_v51 = vld [vmem:[#allocation2 + $0xec] ss:$28 sps:$4 sm:$0xff]  }
  0xef   : > { %1923 = vmatmul.mubr.bf16.gmra.mrb[12].mxu0 %v3095_v36  ;;  %1610 = vmatprep.mubr.bf16.mxu1 %v3102_v38  ;;  %v2598_v36 = vcombine.low %v405_v30, %v405_v30  ;;  %v3204_v38 = vld [vmem:[#allocation2 + $0xc] ss:$28 sps:$4 sm:$0xff]  }
  0xf0   : > { %1932 = vmatprep.mubr.bf16.mxu0 %v3104_v40  ;;  %1712 = vmatpush1.bf16.msra.mxu1 %v3113_v41  ;;  %v3202_v40 = vld [vmem:[#allocation2 + $0x8] ss:$28 sps:$4 sm:$0xff]   ;;  %v3205_v41 = vld [vmem:[#allocation2 + $0x18] ss:$28 sps:$4 sm:$0xff]  }
  0xf1   : > { %1713 = vmatprep.subr.bf16.mxu1 %v3125_v42  ;;  %2034 = vmatpush1.bf16.msra.mxu0 %v3171_v50  ;;  %v3206_v42 = vld [vmem:[#allocation2 + $0x44] ss:$28 sps:$4 sm:$0xff]  }
  0xf2   : > { %2035 = vmatprep.subr.bf16.mxu0 %v3194_v63  ;;  %v3217_v50 = vld [vmem:[#allocation2 + $0xc0] ss:$28 sps:$4 sm:$0xff]   ;;  %v3234_v63 = vld [vmem:[#allocation2 + $0x1cc] ss:$28 sps:$4 sm:$0xff]  }
  0xf4   : > { %1714 = vmatpush1.bf16.msra.mxu1 %v3123_v47  ;;  %v3213_v47 = vld [vmem:[#allocation2 + $0x88] ss:$28 sps:$4 sm:$0xff]  }
  0xf5   : > { %1715 = vmatprep.subr.bf16.mxu1 %v3134_v49  ;;  %2036 = vmatpush1.bf16.msra.mxu0 %v3192_v0  ;;  %v3216_v49 = vld [vmem:[#allocation2 + $0xb0] ss:$28 sps:$4 sm:$0xff]   ;;  %v3236_v0 = vld [vmem:[#allocation2 + $0x1c8] ss:$28 sps:$4 sm:$0xff]  }
  0xf6   : > { %1611 = vmatmul.mubr.bf16.gmra.mrb[16].mxu1 %v3106_v45  ;;  %v3210_v45 = vld [vmem:[#allocation2 + $0x7c] ss:$28 sps:$4 sm:$0xff]  }
  0xf7   : > { %1933 = vmatmul.mubr.bf16.gmra.mrb[16].mxu0 %v3107_v46  ;;  %1620 = vmatprep.mubr.bf16.mxu1 %v3111_v48  ;;  %v3212_v46 = vld [vmem:[#allocation2 + $0x78] ss:$28 sps:$4 sm:$0xff]  }
  0xf8   : > { %1942 = vmatprep.mubr.bf16.mxu0 %v3116_v52  ;;  %1716 = vmatpush1.bf16.msra.mxu1 %v3132_v53  ;;  %v3214_v48 = vld [vmem:[#allocation2 + $0xb4] ss:$28 sps:$4 sm:$0xff]   ;;  %v3220_v52 = vld [vmem:[#allocation2 + $0xe8] ss:$28 sps:$4 sm:$0xff]  }
  0xf9   : > { %1717 = vmatprep.subr.bf16.mxu1 %v3146_v54  ;;  %v3221_v53 = vld [vmem:[#allocation2 + $0xf8] ss:$28 sps:$4 sm:$0xff]   ;;  %v3222_v54 = vld [vmem:[#allocation2 + $0x124] ss:$28 sps:$4 sm:$0xff]  }
  0xfc   : > { %1718 = vmatpush1.bf16.msra.mxu1 %v3144_v55  ;;  %v3224_v55 = vld [vmem:[#allocation2 + $0x120] ss:$28 sps:$4 sm:$0xff]  }
  0xfd   : > { %1719 = vmatprep.subr.bf16.mxu1 %v3155_v57  ;;  %v3226_v57 = vld [vmem:[#allocation2 + $0x15c] ss:$28 sps:$4 sm:$0xff]  }
  0xfe   : > { %1621 = vmatmul.mubr.bf16.gmra.mrb[20].mxu1 %v3121_v56  ;;  %v3225_v56 = vld [vmem:[#allocation2 + $0x130] ss:$28 sps:$4 sm:$0xff]  }
  0xff   : > { %1943 = vmatmul.mubr.bf16.gmra.mrb[20].mxu0 %v3122_v58  ;;  %1630 = vmatprep.mubr.bf16.mxu1 %v3126_v59  ;;  %v3228_v58 = vld [vmem:[#allocation2 + $0x158] ss:$28 sps:$4 sm:$0xff]   ;;  %v3229_v59 = vld [vmem:[#allocation2 + $0x168] ss:$28 sps:$4 sm:$0xff]  }
 0x100   : > { %1952 = vmatprep.mubr.bf16.mxu0 %v3128_v60  ;;  %1720 = vmatpush1.bf16.msra.mxu1 %v3153_v61  ;;  %v3230_v60 = vld [vmem:[#allocation2 + $0x194] ss:$28 sps:$4 sm:$0xff]  }
 0x101   : > { %1721 = vmatprep.subr.bf16.mxu1 %v3166_v62  ;;  %v3232_v61 = vld [vmem:[#allocation2 + $0x190] ss:$28 sps:$4 sm:$0xff]   ;;  %v3233_v62 = vld [vmem:[#allocation2 + $0x1a0] ss:$28 sps:$4 sm:$0xff]  }
 0x104   : > { %1722 = vmatpush1.bf16.msra.mxu1 %v3164_v2  ;;  %v3238_v2 = vld [vmem:[#allocation2 + $0x204] ss:$28 sps:$4 sm:$0xff]  }
 0x105   : > { %1723 = vmatprep.subr.bf16.mxu1 %v3170_v4  ;;  %v3241_v4 = vld [vmem:[#allocation2 + $0x210] ss:$28 sps:$4 sm:$0xff]  }
 0x106   : > { %1631 = vmatmul.mubr.bf16.gmra.mrb[24].mxu1 %v3130_v1  ;;  %v3237_v1 = vld [vmem:[#allocation2 + $0x1d8] ss:$28 sps:$4 sm:$0xff]  }
 0x107   : > { %1953 = vmatmul.mubr.bf16.gmra.mrb[24].mxu0 %v3131_v3  ;;  %1640 = vmatprep.mubr.bf16.mxu1 %v3138_v5  ;;  %v3240_v3 = vld [vmem:[#allocation2 + $0x200] ss:$28 sps:$4 sm:$0xff]  }
 0x108   : > { %1962 = vmatprep.mubr.bf16.mxu0 %v3140_v6  ;;  %1724 = vmatpush1.bf16.msra.mxu1 %v3168_v7  ;;  %v3242_v5 = vld [vmem:[#allocation2 + $0x23c] ss:$28 sps:$4 sm:$0xff]   ;;  %v3245_v7 = vld [vmem:[#allocation2 + $0x248] ss:$28 sps:$4 sm:$0xff]  }
 0x109   : > { %1725 = vmatprep.subr.bf16.mxu1 %v3182_v8  ;;  %v3244_v6 = vld [vmem:[#allocation2 + $0x238] ss:$28 sps:$4 sm:$0xff]  }
 0x10a   : > { %v3246_v8 = vld [vmem:[#allocation2 + $0x274] ss:$28 sps:$4 sm:$0xff]  }
 0x10c   : > { %1726 = vmatpush1.bf16.msra.mxu1 %v3180_v11  ;;  %v3249_v11 = vld [vmem:[#allocation2 + $0x280] ss:$28 sps:$4 sm:$0xff]  }
 0x10d   : > { %1727 = vmatprep.subr.bf16.mxu1 %v3191_v12 }
 0x10e   : > { %1641 = vmatmul.mubr.bf16.gmra.mrb[28].mxu1 %v3142_v9  ;;  %v406_v9 = vld [vmem:[#allocation2 + $0x2a8] sm:$0xff] }
 0x10f   : > { %1963 = vmatmul.mubr.bf16.gmra.mrb[28].mxu0 %v3143_v10  ;;  %1650 = vmatprep.mubr.bf16.mxu1 %v3147_v13  ;;  %v3248_v10 = vld [vmem:[#allocation2 + $0x270] ss:$28 sps:$4 sm:$0xff]   ;;  %v2601_v12 = vcombine.high %v406_v9, %v406_v9  ;;  %v2600_v13 = vcombine.low %v406_v9, %v406_v9 }
 0x110   : > { %1972 = vmatprep.mubr.bf16.mxu0 %v3149_v14  ;;  %1728 = vmatpush1.bf16.msra.mxu1 %v3189_v15  ;;  %v3252_v14 = vld [vmem:[#allocation2 + $0x2b8] ss:$0 sps:$4 sm:$0xff]   ;;  %v2184_v15 = vlaneseq }
 0x111   : > { %1729 = vmatprep.subr.bf16.mxu1 %v3201_v16 }
 0x112   : > { %v2185_v16 = vshrl.u32 %v2184_v15, 7 }
 0x114   : > { %1730 = vmatpush1.bf16.msra.mxu1 %v3199_v18  ;;  %v2182_v18 = vld [vmem:[%s3711_s8] sm:$0x3] }
 0x116   : > { %1651 = vmatmul.mubr.bf16.gmra.mrb[32].mxu1 %v3151_v17  ;;  %v2186_v17 = vsub.s32 0, %v2185_v16 }
 0x117   : > { %1973 = vmatmul.mubr.bf16.gmra.mrb[32].mxu0 %v3152_v19  ;;  %1660 = vmatprep.mubr.bf16.mxu1 %v3159_v20  ;;  %v2190_v19 = vsub.s32 1, %v2185_v16  ;;  %v2244_v20 = vld [vmem:[%s3714_s27] sm:$0x3] }
 0x118   : > { %1982 = vmatprep.mubr.bf16.mxu0 %v3161_v21  ;;  %v3847_v21 = vrot.slane %v2182_v18, %v2186_v17 }
 0x119   : > { %v3854_v30 = vrot.slane %v2244_v20, %v2190_v19 }
 0x11e   : > { %1661 = vmatmul.mubr.bf16.gmra.mrb[36].mxu1 %v3163_v22 }
 0x11f   : > { %1983 = vmatmul.mubr.bf16.gmra.mrb[36].mxu0 %v3167_v23  ;;  %1670 = vmatprep.mubr.bf16.mxu1 %v3174_v24  ;;  %v3850_v24 = vrot.slane %v2182_v18, %v2190_v19 }
 0x120   : > { %1992 = vmatprep.mubr.bf16.mxu0 %v3176_v25 }
 0x126   : > { %1671 = vmatmul.mubr.bf16.gmra.mrb[40].mxu1 %v3178_v26  ;;  %v3852_v26 = vrot.slane %v2244_v20, %v2186_v17 }
 0x127   : > { %1993 = vmatmul.mubr.bf16.gmra.mrb[40].mxu0 %v3179_v27  ;;  %1680 = vmatprep.mubr.bf16.mxu1 %v3183_v28 }
 0x128   : > { %2002 = vmatprep.mubr.bf16.mxu0 %v3185_v29 }
 0x12e   : > { %1681 = vmatmul.mubr.bf16.gmra.mrb[44].mxu1 %v3187_v32 }
 0x12f   : > { %2003 = vmatmul.mubr.bf16.gmra.mrb[44].mxu0 %v3188_v33  ;;  %1690 = vmatprep.mubr.bf16.mxu1 %v2599_v34 }
 0x130   : > { %2012 = vmatprep.mubr.bf16.mxu0 %v2603_v35 }
 0x136   : > { %1691 = vmatmul.mubr.bf16.gmra.mrb[48].mxu1 %v2598_v36 }
 0x137   : > { %2013 = vmatmul.mubr.bf16.gmra.mrb[48].mxu0 %v2602_v37  ;;  %1731 = vmatprep.mubr.bf16.mxu1 %v3204_v38 }
 0x138   : > { %2053 = vmatprep.mubr.bf16.mxu0 %v3456_v39 }
 0x13e   : > { %1732 = vmatmul.mubr.bf16.vlgmr.msra.gmra.mrb[0].mxu1 %v3202_v40 }
 0x13f   : > { %2054 = vmatmul.mubr.bf16.vlgmr.msra.gmra.mrb[0].mxu0 %v3205_v41  ;;  %1741 = vmatprep.mubr.bf16.mxu1 %v3206_v42 }
 0x140   : > { %2063 = vmatprep.mubr.bf16.mxu0 %v3456_v39 }
 0x146   : > { %1742 = vmatmul.mubr.bf16.gmra.mrb[4].mxu1 %v3208_v43 }
 0x147   : > { %2064 = vmatmul.mubr.bf16.gmra.mrb[4].mxu0 %v3209_v44  ;;  %1751 = vmatprep.mubr.bf16.mxu1 %v3210_v45 }
 0x148   : > { %2073 = vmatprep.mubr.bf16.mxu0 %v3456_v39 }
 0x14e   : > { %1752 = vmatmul.mubr.bf16.gmra.mrb[8].mxu1 %v3212_v46 }
 0x14f   : > { %2074 = vmatmul.mubr.bf16.gmra.mrb[8].mxu0 %v3213_v47  ;;  %1761 = vmatprep.mubr.bf16.mxu1 %v3214_v48 }
 0x150   : > { %2083 = vmatprep.mubr.bf16.mxu0 %v3456_v39 }
 0x156   : > { %1762 = vmatmul.mubr.bf16.gmra.mrb[12].mxu1 %v3216_v49 }
 0x157   : > { %2084 = vmatmul.mubr.bf16.gmra.mrb[12].mxu0 %v3217_v50  ;;  %1771 = vmatprep.mubr.bf16.mxu1 %v3218_v51 }
 0x158   : > { %2093 = vmatprep.mubr.bf16.mxu0 %v3456_v39 }
 0x15e   : > { %1772 = vmatmul.mubr.bf16.gmra.mrb[16].mxu1 %v3220_v52 }
 0x15f   : > { %2094 = vmatmul.mubr.bf16.gmra.mrb[16].mxu0 %v3221_v53  ;;  %1781 = vmatprep.mubr.bf16.mxu1 %v3222_v54 }
 0x160   : > { %2103 = vmatprep.mubr.bf16.mxu0 %v3456_v39 }
 0x166   : > { %1782 = vmatmul.mubr.bf16.gmra.mrb[20].mxu1 %v3224_v55 }
 0x167   : > { %2104 = vmatmul.mubr.bf16.gmra.mrb[20].mxu0 %v3225_v56  ;;  %1791 = vmatprep.mubr.bf16.mxu1 %v3226_v57 }
 0x168   : > { %2113 = vmatprep.mubr.bf16.mxu0 %v3456_v39 }
 0x16e   : > { %1792 = vmatmul.mubr.bf16.gmra.mrb[24].mxu1 %v3228_v58 }
 0x16f   : > { %2114 = vmatmul.mubr.bf16.gmra.mrb[24].mxu0 %v3229_v59  ;;  %1801 = vmatprep.mubr.bf16.mxu1 %v3230_v60 }
 0x170   : > { %2123 = vmatprep.mubr.bf16.mxu0 %v3456_v39 }
 0x176   : > { %1802 = vmatmul.mubr.bf16.gmra.mrb[28].mxu1 %v3232_v61 }
 0x177   : > { %2124 = vmatmul.mubr.bf16.gmra.mrb[28].mxu0 %v3233_v62  ;;  %1811 = vmatprep.mubr.bf16.mxu1 %v3234_v63 }
 0x178   : > { %2133 = vmatprep.mubr.bf16.mxu0 %v3456_v39 }
 0x17e   : > { %1812 = vmatmul.mubr.bf16.gmra.mrb[32].mxu1 %v3236_v0 }
 0x17f   : > { %2134 = vmatmul.mubr.bf16.gmra.mrb[32].mxu0 %v3237_v1  ;;  %1821 = vmatprep.mubr.bf16.mxu1 %v3238_v2 }
 0x180   : > { %2143 = vmatprep.mubr.bf16.mxu0 %v3456_v39 }
 0x186   : > { %1822 = vmatmul.mubr.bf16.gmra.mrb[36].mxu1 %v3240_v3 }
 0x187   : > { %2144 = vmatmul.mubr.bf16.gmra.mrb[36].mxu0 %v3241_v4  ;;  %1831 = vmatprep.mubr.bf16.mxu1 %v3242_v5 }
 0x188   : > { %2153 = vmatprep.mubr.bf16.mxu0 %v3456_v39 }
 0x18e   : > { %1832 = vmatmul.mubr.bf16.gmra.mrb[40].mxu1 %v3244_v6 }
 0x18f   : > { %2154 = vmatmul.mubr.bf16.gmra.mrb[40].mxu0 %v3245_v7  ;;  %1841 = vmatprep.mubr.bf16.mxu1 %v3246_v8 }
 0x190   : > { %2163 = vmatprep.mubr.bf16.mxu0 %v3456_v39 }
 0x196   : > { %1842 = vmatmul.mubr.bf16.gmra.mrb[44].mxu1 %v3248_v10 }
 0x197   : > { %2164 = vmatmul.mubr.bf16.gmra.mrb[44].mxu0 %v3249_v11  ;;  %1851 = vmatprep.mubr.bf16.mxu1 %v2601_v12 }
 0x198   : > { %2173 = vmatprep.mubr.bf16.mxu0 %v3456_v39 }
 0x19e   : > { %1852 = vmatmul.mubr.bf16.gmra.mrb[48].mxu1 %v2600_v13 }
 0x19f   : > { %2174 = vmatmul.mubr.bf16.gmra.mrb[48].mxu0 %v3252_v14 }
 0x211   : > { %v1733_v22 = vpop.f32.mrb[0].mxu1 }
 0x212   : > { %v2055_v23 = vpop.f32.mrb[0].mxu0  ;;  %v1735_v27 = vpop.f32.mrb[1].mxu1 }
 0x213   : > { %v2725_v25 = vadd.f32 %v2055_v23, %v1733_v22  ;;  %v2057_v28 = vpop.f32.mrb[1].mxu0  ;;  %v1737_v31 = vpop.f32.mrb[2].mxu1 }
 0x214   : > { %v2726_v29 = vadd.f32 %v2057_v28, %v1735_v27  ;;  %v2059_v32 = vpop.f32.mrb[2].mxu0  ;;  %v1739_v35 = vpop.f32.mrb[3].mxu1 }
 0x215   : > { %v2194_v33 = vmul.f32 %v2725_v25, %v3847_v21  ;;  %v2727_v34 = vadd.f32 %v2059_v32, %v1737_v31  ;;  %v2061_v36 = vpop.f32.mrb[3].mxu0 }
 0x216   : > { %v2195_v37 = vmul.f32 %v2726_v29, %v3850_v24  ;;  %v2728_v38 = vadd.f32 %v2061_v36, %v1739_v35 }
 0x217   : > { %v2256_v39 = vadd.f32 %v3852_v26, %v2194_v33  ;;  %v2196_v40 = vmul.f32 %v2727_v34, %v3847_v21 }
 0x218   : > { %v2257_v41 = vadd.f32 %v3854_v30, %v2195_v37  ;;  %v2197_v42 = vmul.f32 %v2728_v38, %v3850_v24 }
 0x219   : > { %2306 = vst [vmem:[%s3862_s13] sm:$0xff] %v2256_v39  ;;  %v2258_v43 = vadd.f32 %v3852_v26, %v2196_v40  ;;  %v1743_v45 = vpop.f32.mrb[4].mxu1 }
 0x21a   : > { %2307 = vst [vmem:[%s3862_s13 + $0x8] sm:$0xff] %v2257_v41  ;;  %v2259_v44 = vadd.f32 %v3854_v30, %v2197_v42  ;;  %v2065_v46 = vpop.f32.mrb[4].mxu0  ;;  %v1745_v48 = vpop.f32.mrb[5].mxu1 }
 0x21b   : > { %2308 = vst [vmem:[%s3862_s13 + $0x10] sm:$0xff] %v2258_v43  ;;  %v2729_v47 = vadd.f32 %v2065_v46, %v1743_v45  ;;  %v2067_v49 = vpop.f32.mrb[5].mxu0  ;;  %v1747_v51 = vpop.f32.mrb[6].mxu1 }
 0x21c   : > { %2309 = vst [vmem:[%s3862_s13 + $0x18] sm:$0xff] %v2259_v44  ;;  %v2730_v50 = vadd.f32 %v2067_v49, %v1745_v48  ;;  %v2069_v52 = vpop.f32.mrb[6].mxu0  ;;  %v1749_v55 = vpop.f32.mrb[7].mxu1 }
 0x21d   : > { %v2198_v53 = vmul.f32 %v2729_v47, %v3847_v21  ;;  %v2731_v54 = vadd.f32 %v2069_v52, %v1747_v51  ;;  %v2071_v56 = vpop.f32.mrb[7].mxu0 }
 0x21e   : > { %v2199_v57 = vmul.f32 %v2730_v50, %v3850_v24  ;;  %v2732_v58 = vadd.f32 %v2071_v56, %v1749_v55 }
 0x21f   : > { %v2260_v59 = vadd.f32 %v3852_v26, %v2198_v53  ;;  %v2200_v60 = vmul.f32 %v2731_v54, %v3847_v21 }
 0x220   : > { %v2261_v61 = vadd.f32 %v3854_v30, %v2199_v57  ;;  %v2201_v62 = vmul.f32 %v2732_v58, %v3850_v24 }
 0x221   : > { %2310 = vst [vmem:[%s3862_s13 + $0x20] sm:$0xff] %v2260_v59  ;;  %v2262_v63 = vadd.f32 %v3852_v26, %v2200_v60  ;;  %v1753_v1 = vpop.f32.mrb[8].mxu1 }
 0x222   : > { %2311 = vst [vmem:[%s3862_s13 + $0x28] sm:$0xff] %v2261_v61  ;;  %v2263_v0 = vadd.f32 %v3854_v30, %v2201_v62  ;;  %v2075_v2 = vpop.f32.mrb[8].mxu0  ;;  %v1755_v4 = vpop.f32.mrb[9].mxu1 }
 0x223   : > { %2312 = vst [vmem:[%s3862_s13 + $0x30] sm:$0xff] %v2262_v63  ;;  %v2733_v3 = vadd.f32 %v2075_v2, %v1753_v1  ;;  %v2077_v5 = vpop.f32.mrb[9].mxu0  ;;  %v1757_v7 = vpop.f32.mrb[10].mxu1 }
 0x224   : > { %2313 = vst [vmem:[%s3862_s13 + $0x38] sm:$0xff] %v2263_v0  ;;  %v2734_v6 = vadd.f32 %v2077_v5, %v1755_v4  ;;  %v2079_v8 = vpop.f32.mrb[10].mxu0  ;;  %v1759_v11 = vpop.f32.mrb[11].mxu1 }
 0x225   : > { %v2202_v9 = vmul.f32 %v2733_v3, %v3847_v21  ;;  %v2735_v10 = vadd.f32 %v2079_v8, %v1757_v7  ;;  %v2081_v12 = vpop.f32.mrb[11].mxu0 }
 0x226   : > { %v2203_v13 = vmul.f32 %v2734_v6, %v3850_v24  ;;  %v2736_v14 = vadd.f32 %v2081_v12, %v1759_v11 }
 0x227   : > { %v2264_v15 = vadd.f32 %v3852_v26, %v2202_v9  ;;  %v2204_v16 = vmul.f32 %v2735_v10, %v3847_v21 }
 0x228   : > { %v2265_v17 = vadd.f32 %v3854_v30, %v2203_v13  ;;  %v2205_v18 = vmul.f32 %v2736_v14, %v3850_v24 }
 0x229   : > { %2314 = vst [vmem:[%s3862_s13 + $0x40] sm:$0xff] %v2264_v15  ;;  %v2266_v19 = vadd.f32 %v3852_v26, %v2204_v16  ;;  %v1763_v22 = vpop.f32.mrb[12].mxu1 }
 0x22a   : > { %2315 = vst [vmem:[%s3862_s13 + $0x48] sm:$0xff] %v2265_v17  ;;  %v2267_v20 = vadd.f32 %v3854_v30, %v2205_v18  ;;  %v2085_v23 = vpop.f32.mrb[12].mxu0  ;;  %v1765_v27 = vpop.f32.mrb[13].mxu1 }
 0x22b   : > { %2316 = vst [vmem:[%s3862_s13 + $0x50] sm:$0xff] %v2266_v19  ;;  %v2737_v25 = vadd.f32 %v2085_v23, %v1763_v22  ;;  %v2087_v28 = vpop.f32.mrb[13].mxu0  ;;  %v1767_v31 = vpop.f32.mrb[14].mxu1 }
 0x22c   : > { %2317 = vst [vmem:[%s3862_s13 + $0x58] sm:$0xff] %v2267_v20  ;;  %v2738_v29 = vadd.f32 %v2087_v28, %v1765_v27  ;;  %v2089_v32 = vpop.f32.mrb[14].mxu0  ;;  %v1769_v35 = vpop.f32.mrb[15].mxu1 }
 0x22d   : > { %v2206_v33 = vmul.f32 %v2737_v25, %v3847_v21  ;;  %v2739_v34 = vadd.f32 %v2089_v32, %v1767_v31  ;;  %v2091_v36 = vpop.f32.mrb[15].mxu0 }
 0x22e   : > { %v2207_v37 = vmul.f32 %v2738_v29, %v3850_v24  ;;  %v2740_v38 = vadd.f32 %v2091_v36, %v1769_v35 }
 0x22f   : > { %v2268_v39 = vadd.f32 %v3852_v26, %v2206_v33  ;;  %v2208_v40 = vmul.f32 %v2739_v34, %v3847_v21 }
 0x230   : > { %v2269_v41 = vadd.f32 %v3854_v30, %v2207_v37  ;;  %v2209_v42 = vmul.f32 %v2740_v38, %v3850_v24 }
 0x231   : > { %2318 = vst [vmem:[%s3862_s13 + $0x60] sm:$0xff] %v2268_v39  ;;  %v2270_v43 = vadd.f32 %v3852_v26, %v2208_v40  ;;  %v1773_v45 = vpop.f32.mrb[16].mxu1 }
 0x232   : > { %2319 = vst [vmem:[%s3862_s13 + $0x68] sm:$0xff] %v2269_v41  ;;  %v2271_v44 = vadd.f32 %v3854_v30, %v2209_v42  ;;  %v2095_v46 = vpop.f32.mrb[16].mxu0  ;;  %v1775_v48 = vpop.f32.mrb[17].mxu1 }
 0x233   : > { %2320 = vst [vmem:[%s3862_s13 + $0x70] sm:$0xff] %v2270_v43  ;;  %v2741_v47 = vadd.f32 %v2095_v46, %v1773_v45  ;;  %v2097_v49 = vpop.f32.mrb[17].mxu0  ;;  %v1777_v51 = vpop.f32.mrb[18].mxu1 }
 0x234   : > { %2321 = vst [vmem:[%s3862_s13 + $0x78] sm:$0xff] %v2271_v44  ;;  %v2742_v50 = vadd.f32 %v2097_v49, %v1775_v48  ;;  %v2099_v52 = vpop.f32.mrb[18].mxu0  ;;  %v1779_v55 = vpop.f32.mrb[19].mxu1 }
 0x235   : > { %v2210_v53 = vmul.f32 %v2741_v47, %v3847_v21  ;;  %v2743_v54 = vadd.f32 %v2099_v52, %v1777_v51  ;;  %v2101_v56 = vpop.f32.mrb[19].mxu0 }
 0x236   : > { %v2211_v57 = vmul.f32 %v2742_v50, %v3850_v24  ;;  %v2744_v58 = vadd.f32 %v2101_v56, %v1779_v55 }
 0x237   : > { %v2272_v59 = vadd.f32 %v3852_v26, %v2210_v53  ;;  %v2212_v60 = vmul.f32 %v2743_v54, %v3847_v21 }
 0x238   : > { %v2273_v61 = vadd.f32 %v3854_v30, %v2211_v57  ;;  %v2213_v62 = vmul.f32 %v2744_v58, %v3850_v24 }
 0x239   : > { %2322 = vst [vmem:[%s3862_s13 + $0x80] sm:$0xff] %v2272_v59  ;;  %v2274_v63 = vadd.f32 %v3852_v26, %v2212_v60  ;;  %v1783_v1 = vpop.f32.mrb[20].mxu1 }
 0x23a   : > { %2323 = vst [vmem:[%s3862_s13 + $0x88] sm:$0xff] %v2273_v61  ;;  %v2275_v0 = vadd.f32 %v3854_v30, %v2213_v62  ;;  %v2105_v2 = vpop.f32.mrb[20].mxu0  ;;  %v1785_v4 = vpop.f32.mrb[21].mxu1 }
 0x23b   : > { %2324 = vst [vmem:[%s3862_s13 + $0x90] sm:$0xff] %v2274_v63  ;;  %v2745_v3 = vadd.f32 %v2105_v2, %v1783_v1  ;;  %v2107_v5 = vpop.f32.mrb[21].mxu0  ;;  %v1787_v7 = vpop.f32.mrb[22].mxu1 }
 0x23c   : > { %2325 = vst [vmem:[%s3862_s13 + $0x98] sm:$0xff] %v2275_v0  ;;  %v2746_v6 = vadd.f32 %v2107_v5, %v1785_v4  ;;  %v2109_v8 = vpop.f32.mrb[22].mxu0  ;;  %v1789_v11 = vpop.f32.mrb[23].mxu1 }
 0x23d   : > { %v2214_v9 = vmul.f32 %v2745_v3, %v3847_v21  ;;  %v2747_v10 = vadd.f32 %v2109_v8, %v1787_v7  ;;  %v2111_v12 = vpop.f32.mrb[23].mxu0 }
 0x23e   : > { %v2215_v13 = vmul.f32 %v2746_v6, %v3850_v24  ;;  %v2748_v14 = vadd.f32 %v2111_v12, %v1789_v11 }
 0x23f   : > { %v2276_v15 = vadd.f32 %v3852_v26, %v2214_v9  ;;  %v2216_v16 = vmul.f32 %v2747_v10, %v3847_v21 }
 0x240   : > { %v2277_v17 = vadd.f32 %v3854_v30, %v2215_v13  ;;  %v2217_v18 = vmul.f32 %v2748_v14, %v3850_v24 }
 0x241   : > { %2326 = vst [vmem:[%s3862_s13 + $0xa0] sm:$0xff] %v2276_v15  ;;  %v2278_v19 = vadd.f32 %v3852_v26, %v2216_v16  ;;  %v1793_v22 = vpop.f32.mrb[24].mxu1 }
 0x242   : > { %2327 = vst [vmem:[%s3862_s13 + $0xa8] sm:$0xff] %v2277_v17  ;;  %v2279_v20 = vadd.f32 %v3854_v30, %v2217_v18  ;;  %v2115_v23 = vpop.f32.mrb[24].mxu0  ;;  %v1795_v27 = vpop.f32.mrb[25].mxu1 }
 0x243   : > { %2328 = vst [vmem:[%s3862_s13 + $0xb0] sm:$0xff] %v2278_v19  ;;  %v2749_v25 = vadd.f32 %v2115_v23, %v1793_v22  ;;  %v2117_v28 = vpop.f32.mrb[25].mxu0  ;;  %v1797_v31 = vpop.f32.mrb[26].mxu1 }
 0x244   : > { %2329 = vst [vmem:[%s3862_s13 + $0xb8] sm:$0xff] %v2279_v20  ;;  %v2750_v29 = vadd.f32 %v2117_v28, %v1795_v27  ;;  %v2119_v32 = vpop.f32.mrb[26].mxu0  ;;  %v1799_v35 = vpop.f32.mrb[27].mxu1 }
 0x245   : > { %v2218_v33 = vmul.f32 %v2749_v25, %v3847_v21  ;;  %v2751_v34 = vadd.f32 %v2119_v32, %v1797_v31  ;;  %v2121_v36 = vpop.f32.mrb[27].mxu0 }
 0x246   : > { %v2219_v37 = vmul.f32 %v2750_v29, %v3850_v24  ;;  %v2752_v38 = vadd.f32 %v2121_v36, %v1799_v35 }
 0x247   : > { %v2280_v39 = vadd.f32 %v3852_v26, %v2218_v33  ;;  %v2220_v40 = vmul.f32 %v2751_v34, %v3847_v21 }
 0x248   : > { %v2281_v41 = vadd.f32 %v3854_v30, %v2219_v37  ;;  %v2221_v42 = vmul.f32 %v2752_v38, %v3850_v24 }
 0x249   : > { %2330 = vst [vmem:[%s3862_s13 + $0xc0] sm:$0xff] %v2280_v39  ;;  %v2282_v43 = vadd.f32 %v3852_v26, %v2220_v40  ;;  %v1803_v45 = vpop.f32.mrb[28].mxu1 }
 0x24a   : > { %2331 = vst [vmem:[%s3862_s13 + $0xc8] sm:$0xff] %v2281_v41  ;;  %v2283_v44 = vadd.f32 %v3854_v30, %v2221_v42  ;;  %v2125_v46 = vpop.f32.mrb[28].mxu0  ;;  %v1805_v48 = vpop.f32.mrb[29].mxu1 }
 0x24b   : > { %2332 = vst [vmem:[%s3862_s13 + $0xd0] sm:$0xff] %v2282_v43  ;;  %v2753_v47 = vadd.f32 %v2125_v46, %v1803_v45  ;;  %v2127_v49 = vpop.f32.mrb[29].mxu0  ;;  %v1807_v51 = vpop.f32.mrb[30].mxu1 }
 0x24c   : > { %2333 = vst [vmem:[%s3862_s13 + $0xd8] sm:$0xff] %v2283_v44  ;;  %v2754_v50 = vadd.f32 %v2127_v49, %v1805_v48  ;;  %v2129_v52 = vpop.f32.mrb[30].mxu0  ;;  %v1809_v55 = vpop.f32.mrb[31].mxu1 }
 0x24d   : > { %v2222_v53 = vmul.f32 %v2753_v47, %v3847_v21  ;;  %v2755_v54 = vadd.f32 %v2129_v52, %v1807_v51  ;;  %v2131_v56 = vpop.f32.mrb[31].mxu0 }
 0x24e   : > { %v2223_v57 = vmul.f32 %v2754_v50, %v3850_v24  ;;  %v2756_v58 = vadd.f32 %v2131_v56, %v1809_v55 }
 0x24f   : > { %v2284_v59 = vadd.f32 %v3852_v26, %v2222_v53  ;;  %v2224_v60 = vmul.f32 %v2755_v54, %v3847_v21 }
 0x250   : > { %v2285_v61 = vadd.f32 %v3854_v30, %v2223_v57  ;;  %v2225_v62 = vmul.f32 %v2756_v58, %v3850_v24 }
 0x251   : > { %2334 = vst [vmem:[%s3862_s13 + $0xe0] sm:$0xff] %v2284_v59  ;;  %v2286_v63 = vadd.f32 %v3852_v26, %v2224_v60  ;;  %v1813_v1 = vpop.f32.mrb[32].mxu1 }
 0x252   : > { %2335 = vst [vmem:[%s3862_s13 + $0xe8] sm:$0xff] %v2285_v61  ;;  %v2287_v0 = vadd.f32 %v3854_v30, %v2225_v62  ;;  %v2135_v2 = vpop.f32.mrb[32].mxu0  ;;  %v1815_v4 = vpop.f32.mrb[33].mxu1 }
 0x253   : > { %2336 = vst [vmem:[%s3862_s13 + $0xf0] sm:$0xff] %v2286_v63  ;;  %v2757_v3 = vadd.f32 %v2135_v2, %v1813_v1  ;;  %v2137_v5 = vpop.f32.mrb[33].mxu0  ;;  %v1817_v7 = vpop.f32.mrb[34].mxu1 }
 0x254   : > { %2337 = vst [vmem:[%s3862_s13 + $0xf8] sm:$0xff] %v2287_v0  ;;  %v2758_v6 = vadd.f32 %v2137_v5, %v1815_v4  ;;  %v2139_v8 = vpop.f32.mrb[34].mxu0  ;;  %v1819_v11 = vpop.f32.mrb[35].mxu1 }
 0x255   : > { %v2226_v9 = vmul.f32 %v2757_v3, %v3847_v21  ;;  %v2759_v10 = vadd.f32 %v2139_v8, %v1817_v7  ;;  %v2141_v12 = vpop.f32.mrb[35].mxu0 }
 0x256   : > { %v2227_v13 = vmul.f32 %v2758_v6, %v3850_v24  ;;  %v2760_v14 = vadd.f32 %v2141_v12, %v1819_v11 }
 0x257   : > { %v2288_v15 = vadd.f32 %v3852_v26, %v2226_v9  ;;  %v2228_v16 = vmul.f32 %v2759_v10, %v3847_v21 }
 0x258   : > { %v2289_v17 = vadd.f32 %v3854_v30, %v2227_v13  ;;  %v2229_v18 = vmul.f32 %v2760_v14, %v3850_v24 }
 0x259   : > { %2338 = vst [vmem:[%s3862_s13 + $0x100] sm:$0xff] %v2288_v15  ;;  %v2290_v19 = vadd.f32 %v3852_v26, %v2228_v16  ;;  %v1823_v22 = vpop.f32.mrb[36].mxu1 }
 0x25a   : > { %2339 = vst [vmem:[%s3862_s13 + $0x108] sm:$0xff] %v2289_v17  ;;  %v2291_v20 = vadd.f32 %v3854_v30, %v2229_v18  ;;  %v2145_v23 = vpop.f32.mrb[36].mxu0  ;;  %v1825_v27 = vpop.f32.mrb[37].mxu1 }
 0x25b   : > { %2340 = vst [vmem:[%s3862_s13 + $0x110] sm:$0xff] %v2290_v19  ;;  %v2761_v25 = vadd.f32 %v2145_v23, %v1823_v22  ;;  %v2147_v28 = vpop.f32.mrb[37].mxu0  ;;  %v1827_v31 = vpop.f32.mrb[38].mxu1 }
 0x25c   : > { %2341 = vst [vmem:[%s3862_s13 + $0x118] sm:$0xff] %v2291_v20  ;;  %v2762_v29 = vadd.f32 %v2147_v28, %v1825_v27  ;;  %v2149_v32 = vpop.f32.mrb[38].mxu0  ;;  %v1829_v35 = vpop.f32.mrb[39].mxu1 }
 0x25d   : > { %v2230_v33 = vmul.f32 %v2761_v25, %v3847_v21  ;;  %v2763_v34 = vadd.f32 %v2149_v32, %v1827_v31  ;;  %v2151_v36 = vpop.f32.mrb[39].mxu0 }
 0x25e   : > { %v2231_v37 = vmul.f32 %v2762_v29, %v3850_v24  ;;  %v2764_v38 = vadd.f32 %v2151_v36, %v1829_v35 }
 0x25f   : > { %v2292_v39 = vadd.f32 %v3852_v26, %v2230_v33  ;;  %v2232_v40 = vmul.f32 %v2763_v34, %v3847_v21 }
 0x260   : > { %v2293_v41 = vadd.f32 %v3854_v30, %v2231_v37  ;;  %v2233_v42 = vmul.f32 %v2764_v38, %v3850_v24 }
 0x261   : > { %2342 = vst [vmem:[%s3862_s13 + $0x120] sm:$0xff] %v2292_v39  ;;  %v2294_v43 = vadd.f32 %v3852_v26, %v2232_v40  ;;  %v1833_v45 = vpop.f32.mrb[40].mxu1 }
 0x262   : > { %2343 = vst [vmem:[%s3862_s13 + $0x128] sm:$0xff] %v2293_v41  ;;  %v2295_v44 = vadd.f32 %v3854_v30, %v2233_v42  ;;  %v2155_v46 = vpop.f32.mrb[40].mxu0  ;;  %v1835_v48 = vpop.f32.mrb[41].mxu1 }
 0x263   : > { %2344 = vst [vmem:[%s3862_s13 + $0x130] sm:$0xff] %v2294_v43  ;;  %v2765_v47 = vadd.f32 %v2155_v46, %v1833_v45  ;;  %v2157_v49 = vpop.f32.mrb[41].mxu0  ;;  %v1837_v51 = vpop.f32.mrb[42].mxu1 }
 0x264   : > { %2345 = vst [vmem:[%s3862_s13 + $0x138] sm:$0xff] %v2295_v44  ;;  %v2766_v50 = vadd.f32 %v2157_v49, %v1835_v48  ;;  %v2159_v52 = vpop.f32.mrb[42].mxu0  ;;  %v1839_v55 = vpop.f32.mrb[43].mxu1 }
 0x265   : > { %v2234_v53 = vmul.f32 %v2765_v47, %v3847_v21  ;;  %v2767_v54 = vadd.f32 %v2159_v52, %v1837_v51  ;;  %v2161_v56 = vpop.f32.mrb[43].mxu0 }
 0x266   : > { %v2235_v57 = vmul.f32 %v2766_v50, %v3850_v24  ;;  %v2768_v58 = vadd.f32 %v2161_v56, %v1839_v55 }
 0x267   : > { %v2296_v59 = vadd.f32 %v3852_v26, %v2234_v53  ;;  %v2236_v60 = vmul.f32 %v2767_v54, %v3847_v21 }
 0x268   : > { %v2297_v61 = vadd.f32 %v3854_v30, %v2235_v57  ;;  %v2237_v62 = vmul.f32 %v2768_v58, %v3850_v24 }
 0x269   : > { %2346 = vst [vmem:[%s3862_s13 + $0x140] sm:$0xff] %v2296_v59  ;;  %v2298_v63 = vadd.f32 %v3852_v26, %v2236_v60  ;;  %v1843_v1 = vpop.f32.mrb[44].mxu1 }
 0x26a   : > { %2347 = vst [vmem:[%s3862_s13 + $0x148] sm:$0xff] %v2297_v61  ;;  %v2299_v0 = vadd.f32 %v3854_v30, %v2237_v62  ;;  %v2165_v2 = vpop.f32.mrb[44].mxu0  ;;  %v1845_v4 = vpop.f32.mrb[45].mxu1 }
 0x26b   : > { %2348 = vst [vmem:[%s3862_s13 + $0x150] sm:$0xff] %v2298_v63  ;;  %v2769_v3 = vadd.f32 %v2165_v2, %v1843_v1  ;;  %v2167_v5 = vpop.f32.mrb[45].mxu0  ;;  %v1847_v7 = vpop.f32.mrb[46].mxu1 }
 0x26c   : > { %2349 = vst [vmem:[%s3862_s13 + $0x158] sm:$0xff] %v2299_v0  ;;  %v2770_v6 = vadd.f32 %v2167_v5, %v1845_v4  ;;  %v2169_v8 = vpop.f32.mrb[46].mxu0  ;;  %v1849_v11 = vpop.f32.mrb[47].mxu1 }
 0x26d   : > { %v2238_v9 = vmul.f32 %v2769_v3, %v3847_v21  ;;  %v2771_v10 = vadd.f32 %v2169_v8, %v1847_v7  ;;  %v2171_v12 = vpop.f32.mrb[47].mxu0 }
 0x26e   : > { %v2239_v13 = vmul.f32 %v2770_v6, %v3850_v24  ;;  %v2772_v14 = vadd.f32 %v2171_v12, %v1849_v11 }
 0x26f   : > { %v2300_v15 = vadd.f32 %v3852_v26, %v2238_v9  ;;  %v2240_v16 = vmul.f32 %v2771_v10, %v3847_v21 }
 0x270   : > { %v2301_v17 = vadd.f32 %v3854_v30, %v2239_v13  ;;  %v2241_v18 = vmul.f32 %v2772_v14, %v3850_v24 }
 0x271   : > { %2350 = vst [vmem:[%s3862_s13 + $0x160] sm:$0xff] %v2300_v15  ;;  %v2302_v19 = vadd.f32 %v3852_v26, %v2240_v16  ;;  %v1853_v22 = vpop.f32.mrb[48].mxu1 }
 0x272   : > { %2351 = vst [vmem:[%s3862_s13 + $0x168] sm:$0xff] %v2301_v17  ;;  %v2303_v20 = vadd.f32 %v3854_v30, %v2241_v18  ;;  %v2175_v23 = vpop.f32.mrb[48].mxu0  ;;  %v1855_v27 = vpop.f32.mrb[49].mxu1 }
 0x273   : > { %2352 = vst [vmem:[%s3862_s13 + $0x170] sm:$0xff] %v2302_v19  ;;  %v2773_v25 = vadd.f32 %v2175_v23, %v1853_v22  ;;  %v2177_v28 = vpop.f32.mrb[49].mxu0  ;;  %v1857_v31 = vpop.f32.mrb[50].mxu1 }
 0x274   : > { %2353 = vst [vmem:[%s3862_s13 + $0x178] sm:$0xff] %v2303_v20  ;;  %v2774_v29 = vadd.f32 %v2177_v28, %v1855_v27  ;;  %v2179_v32 = vpop.f32.mrb[50].mxu0  ;;  %v1858_v34 = vpop.f32.mrb[51].mxu1 }
 0x275   : > { %v2242_v33 = vmul.f32 %v2773_v25, %v3847_v21  ;;  %v2180_v35 = vpop.f32.mrb[51].mxu0 }
 0x276   : > { %v2243_v36 = vmul.f32 %v2774_v29, %v3850_v24 }
 0x277   : > { %v2304_v37 = vadd.f32 %v3852_v26, %v2242_v33 }
 0x278   : > { %v2305_v38 = vadd.f32 %v3854_v30, %v2243_v36 }
 0x279   : > { %2354 = vst [vmem:[%s3862_s13 + $0x180] sm:$0xff] %v2304_v37 }
 0x27a   : > { %2355 = vst [vmem:[%s3862_s13 + $0x188] sm:$0xff] %v2305_v38 }
 0x27b   : > { %3384 = shalt.err (!%p3381_p10)
}
 0x27c   : > { %s3385_s9 = scalar_lea.hbm %s4009_s17, 6400  ;;  %s3389_s23 = scalar_lea.hbm %s4062_s4, 25600 }
 0x27d   : > { %p3386_p1 = scmp.ne.s32.totalorder %s4009_s17, %s3385_s9  ;;  %p3390_p12 = scmp.lt.u32.totalorder %s4009_s17, %s4062_s4 }
 0x27e   : > { %p3391_p6 = scmp.lt.u32.totalorder %s3389_s23, %s3385_s9  ;;  %p3393_p3 = scmp.lt.u32.totalorder %s3385_s9, %s4009_s17 }
 0x27f   : > { %p3387_p13 = pnand %p3386_p1, %p4096_p8 }
 0x280   : > { %p3392_p5 = por %p3391_p6, %p3390_p12 }
 0x281   : > { %p3388_p0 = pneg %p3387_p13 }
 0x282   : > { %p3394_p11 = por %p3393_p3, %p3392_p5 }
 0x284   : > { %p3395_p9 = pnand %p3394_p11, %p3388_p0 }
 0x286   : > { %3398 = shalt.err (!%p3395_p9)
}
 0x287   : > { %s3458_s25 = smov 256   ;;  %s3459_s27 = smov 1024  }
 0x288   : > { %s3460_s10 = smov 16  }
 0x289   : > { %2892 = dma.vmem_to_hbm [thread:$0]  (%p4096_p8), %s4012_s26, 6400, %s4009_s17, %s2357_s5, %s3458_s25, %s3459_s27, %s3460_s10  }
 0x28a PF: > { %p2915_p2 = scmp.ge.s32.totalorder %s3445_s18, 2  ;;  %s2385_s13 = sand.u32 1, %s3433_s15  }
 0x28b   : > { %p4097_p7 = scmp.ne.s32.totalorder %s4084_s6, 0  ;;  %s2386_s7 = scalar_lea.sflag [#allocation4], %s2385_s13 }
 0x28d   : > { %p2909_p4 = pnand %p2915_p2, %p4097_p7 }
 0x28f   : > { %3428 = dma.done.wait (!%p2909_p4), %s2386_s7, 6400  }
 0x290   : > { %3430 = vsyncadd (!%p2909_p4), %s2386_s7, 4294960896  ;;  %s4098_s28 = sld [smem:[#allocation15_spill]]  ;;  %s4099_s17 = sld [smem:[#allocation16_spill]] }
 0x291   : > { %p21_p10 = scmp.ge.s32.totalorder %s3507_s19, 6   ;;  %s4100_s15 = smov %s3437_s16 }
 0x292   : > { %s4102_s18 = smov %s3507_s19 }
 0x293   :  { %23 = sbr.rel (!%p21_p10) target bundleno = 10 (0xa), region = 110 }
 0x296   : > { %s4101_s16 = smov %s4098_s28 }
 0x29a   :  { %2391 = vsyncpa [#allocation3], 1 }
 0x29b   :  { %2393 = vsyncpa [#allocation3 + $0x1], 1 }
 0x29c   :  { %2394 = vsyncpa [#allocation6], 1 }
 0x29d   :  { %2396 = vsyncpa [#allocation6 + $0x1], 1 }
 0x29e   :  { %2397 = vsyncpa [#allocation9], 1 }
 0x29f   :  { %2399 = vsyncpa [#allocation9 + $0x1], 1 }
 0x2a0   :  { %2400 = vsyncpa [#allocation4], 1 }
 0x2a1   :  { %2402 = vsyncpa [#allocation4 + $0x1], 1 }

</bundles_post_ra>
